<compile_context>
chip_gen: v6e
topology: v6e:2x2x1
jax: 0.10.0
libtpu: 0.0.40
codegen_flags: <defaults>
</compile_context>

<pallas_src>
import functools
import math

import jax
import jax.numpy as jnp
from jax.experimental import pallas as pl
from jax.experimental.pallas import tpu as pltpu

_NUM_FTS = 4        # lnkt, lnz, lndelta, lnm2


# ----------------------------------------------------------------------------
# tanh-form GELU: 1 EUP tanh + ~7 VALU ops per element (vs ~16 VALU + divide
# for the erf polynomial).  |gelu_tanh - gelu_exact| <~ 3e-4.
# ----------------------------------------------------------------------------
def _gelu_tanh(x):
    c0 = 0.7978845608028654  # sqrt(2/pi)
    return 0.5 * x * (1.0 + jnp.tanh(c0 * (x + 0.044715 * (x * x * x))))


# ----------------------------------------------------------------------------
# Kernel 1: pairwise Lorentz-vector features over a (Ti x Tj) pair tile.
#   xi_ref: (1, Ti, 7) particle-major [px,py,pz,E,pt,rap,phi] for the i-tile
#   xj_ref: (1, 7, Tj) channel-major for the j-tile
#   o_ref : (1, 4, Ti, Tj) feature planes
# i-side columns / j-side rows are sliced once per tile; reused (Ti,Tj) planes
# (ptmin, delta, sums) are materialized once so nothing is re-broadcast.
# ----------------------------------------------------------------------------
def _pair_fts_kernel(xi_ref, xj_ref, o_ref, *, eps):
    xi = xi_ref[0].astype(jnp.float32)   # (Ti, 7)
    xj = xj_ref[0].astype(jnp.float32)   # (7, Tj)

    pxi, pyi, pzi, ei = xi[:, 0:1], xi[:, 1:2], xi[:, 2:3], xi[:, 3:4]
    pti, rapi, phii = xi[:, 4:5], xi[:, 5:6], xi[:, 6:7]
    pxj, pyj, pzj, ej = xj[0:1, :], xj[1:2, :], xj[2:3, :], xj[3:4, :]
    ptj, rapj, phij = xj[4:5, :], xj[5:6, :], xj[6:7, :]

    two_pi = 2.0 * math.pi
    inv_two_pi = 1.0 / two_pi
    d = phii - phij + math.pi                          # (Ti, Tj)
    dphi = d - two_pi * jnp.floor(d * inv_two_pi) - math.pi
    drap = rapi - rapj
    delta = jnp.sqrt(drap * drap + dphi * dphi)
    lndelta = jnp.log(jnp.maximum(delta, eps))

    ptmin = jnp.minimum(pti, ptj)                      # (Ti, Tj), reused
    lnkt = jnp.log(jnp.maximum(ptmin * delta, eps))
    inv_ptsum = pl.reciprocal(jnp.maximum(pti + ptj, eps), approx=True)
    lnz = jnp.log(jnp.maximum(ptmin * inv_ptsum, eps))

    es, pxs, pys, pzs = ei + ej, pxi + pxj, pyi + pyj, pzi + pzj
    m2 = es * es - (pxs * pxs + pys * pys + pzs * pzs)
    lnm2 = jnp.log(jnp.maximum(m2, eps))

    o_ref[0, 0] = lnkt.astype(o_ref.dtype)
    o_ref[0, 1] = lnz.astype(o_ref.dtype)
    o_ref[0, 2] = lndelta.astype(o_ref.dtype)
    o_ref[0, 3] = lnm2.astype(o_ref.dtype)


# ----------------------------------------------------------------------------
# Kernel 2: BN-folded 1x1-conv MLP, channel-major MXU matmuls over a lane-dense
# pair tile.  refs = (f_ref, W1, b1, ..., WL, bL, o_ref);
# f_ref: (1, 4, Tp), o_ref: (1, out_dim, Tp).
# ----------------------------------------------------------------------------
def _mlp_kernel(*refs, num_layers, mxu_bf16):
    f_ref, o_ref = refs[0], refs[-1]
    mxu_dtype = jnp.bfloat16 if mxu_bf16 else jnp.float32
    h = f_ref[0].astype(jnp.float32)                   # (C0, Tp)
    for k in range(num_layers):
        w = refs[1 + 2 * k][...].astype(mxu_dtype)
        b = refs[2 + 2 * k][...].astype(jnp.float32)
        h = jnp.dot(w, h.astype(mxu_dtype),
                    preferred_element_type=jnp.float32) + b
        if k < num_layers - 1:
            h = _gelu_tanh(h)
    o_ref[0] = h.astype(o_ref.dtype)


# ----------------------------------------------------------------------------
# One-time parameter prep: fold eval-mode BatchNorms into the 1x1 convs.
# ----------------------------------------------------------------------------
def _fold_bn(params, *, bn_eps=1e-5):
    (g0, b0, rm0, rv0), layers = params
    s = g0 / jnp.sqrt(rv0 + bn_eps)                    # input BN scale
    t = b0 - rm0 * s                                   # input BN shift
    folded = []
    for (W, bc, gm, bt, rm, rv) in layers:
        We = W * s[None, :]
        be = bc + W @ t
        sk = gm / jnp.sqrt(rv + bn_eps)
        tk = bt - rm * sk
        We = We * sk[:, None]
        be = be * sk + tk
        folded.append((We, be))
        s = jnp.ones((W.shape[0],), W.dtype)
        t = jnp.zeros((W.shape[0],), W.dtype)
    return folded


def _largest_divisor_tile(n, candidates):
    for c in candidates:
        if n % c == 0:
            return c
    return n  # unreachable: n is always a multiple of 128 here


# ----------------------------------------------------------------------------
# Wrapper
# ----------------------------------------------------------------------------
def pair_embed(x, params, *, eps=1e-8, bn_eps=1e-5,
               mxu_bf16=False, out_dtype=jnp.float32):
    """x: (batch, 4, seq_len) -> (batch, out_dim, seq_len, seq_len)."""
    B, in_dim, S = x.shape
    assert in_dim == 4
    folded = _fold_bn(params, bn_eps=bn_eps)
    out_dim = folded[-1][0].shape[0]
    num_layers = len(folded)

    # Pad the particle axis to a multiple of 128 -> every block below is
    # (8,128)-aligned and bounded in VMEM for any S.  Padded particles are
    # all-zero 4-vectors; their features hit the eps clamps (finite) and the
    # padded rows/cols are sliced off at the end.
    S_pad = max(128, -(-S // 128) * 128)
    if S_pad != S:
        x = jnp.pad(x, ((0, 0), (0, 0), (0, S_pad - S)))

    # Per-particle prep (tiny, O(B*S)); kernels only do the O(B*S^2) part.
    px, py, pz, e = x[:, 0], x[:, 1], x[:, 2], x[:, 3]
    pt = jnp.sqrt(px * px + py * py)
    rap = 0.5 * jnp.log(1.0 + 2.0 * pz / jnp.maximum(e - pz, 1e-20))
    phi = jnp.arctan2(py, px)
    feats_cm = jnp.concatenate(
        [x, pt[:, None], rap[:, None], phi[:, None]], axis=1)   # (B, 7, S_pad)
    feats_pm = jnp.transpose(feats_cm, (0, 2, 1))               # (B, S_pad, 7)

    # --- Kernel 1: pairwise features, grid (B, S_pad/Ti, S_pad/Tj) ---
    Ti = _largest_divisor_tile(S_pad, (256, 128))
    Tj = _largest_divisor_tile(S_pad, (512, 256, 128))
    fts = pl.pallas_call(
        functools.partial(_pair_fts_kernel, eps=eps),
        grid=(B, S_pad // Ti, S_pad // Tj),
        in_specs=[
            pl.BlockSpec((1, Ti, 7), lambda b, i, j: (b, i, 0)),
            pl.BlockSpec((1, 7, Tj), lambda b, i, j: (b, 0, j)),
        ],
        out_specs=pl.BlockSpec((1, _NUM_FTS, Ti, Tj),
                               lambda b, i, j: (b, 0, i, j)),
        out_shape=jax.ShapeDtypeStruct((B, _NUM_FTS, S_pad, S_pad),
                                       jnp.float32),
        compiler_params=pltpu.CompilerParams(
            dimension_semantics=("parallel", "parallel", "parallel"),
            vmem_limit_bytes=32 * 1024 * 1024),
    )(feats_pm, feats_cm)

    # --- Kernel 2: BN-folded MLP, grid (B, P/Tp), lane-dense pair tiles ---
    P = S_pad * S_pad                       # multiple of 16384
    Tp = min(P, 8192)                       # always divides P exactly
    fts_flat = fts.reshape(B, _NUM_FTS, P)  # contiguous -> free reshape

    wdt = jnp.bfloat16 if mxu_bf16 else jnp.float32
    in_specs = [pl.BlockSpec((1, _NUM_FTS, Tp), lambda b, p: (b, 0, p))]
    flat_args = [fts_flat]
    for We, be in folded:
        dout, din = We.shape
        in_specs.append(pl.BlockSpec((dout, din), lambda b, p: (0, 0)))
        in_specs.append(pl.BlockSpec((dout, 1), lambda b, p: (0, 0)))
        flat_args += [We.astype(wdt), be.reshape(dout, 1).astype(jnp.float32)]

    out = pl.pallas_call(
        functools.partial(_mlp_kernel, num_layers=num_layers,
                          mxu_bf16=mxu_bf16),
        grid=(B, P // Tp),
        in_specs=in_specs,
        out_specs=pl.BlockSpec((1, out_dim, Tp), lambda b, p: (b, 0, p)),
        out_shape=jax.ShapeDtypeStruct((B, out_dim, P), out_dtype),
        compiler_params=pltpu.CompilerParams(
            dimension_semantics=("parallel", "parallel"),
            vmem_limit_bytes=32 * 1024 * 1024),
    )(*flat_args)

    out = out.reshape(B, out_dim, S_pad, S_pad)                  # free reshape
    if S_pad != S:
        out = out[:, :, :S, :S]
    return out


# ----------------------------------------------------------------------------
# Pure-JAX reference mirroring the PyTorch module (symmetric tril + scatter,
# exact-erf GELU, eval-mode BatchNorm).
# ----------------------------------------------------------------------------
def pair_embed_ref(x, params, *, eps=1e-8, bn_eps=1e-5):
    B, _, S = x.shape
    (g0, b0, rm0, rv0), layers = params
    i, j = jnp.tril_indices(S)
    xi, xj = x[:, :, i], x[:, :, j]                              # (B, 4, P)

    def ptrapphi(v):
        px, py, pz, e = v[:, 0], v[:, 1], v[:, 2], v[:, 3]
        pt = jnp.sqrt(px * px + py * py)
        rap = 0.5 * jnp.log(1.0 + 2.0 * pz / jnp.maximum(e - pz, 1e-20))
        phi = jnp.arctan2(py, px)
        return pt, rap, phi

    pti, rapi, phii = ptrapphi(xi)
    ptj, rapj, phij = ptrapphi(xj)
    dphi = jnp.mod(phii - phij + math.pi, 2.0 * math.pi) - math.pi
    delta = jnp.sqrt((rapi - rapj) ** 2 + dphi ** 2)
    lndelta = jnp.log(jnp.maximum(delta, eps))
    ptmin = jnp.minimum(pti, ptj)
    lnkt = jnp.log(jnp.maximum(ptmin * delta, eps))
    lnz = jnp.log(jnp.maximum(ptmin / jnp.maximum(pti + ptj, eps), eps))
    xs = xi + xj
    m2 = jnp.maximum(xs[:, 3] ** 2
                     - (xs[:, 0] ** 2 + xs[:, 1] ** 2 + xs[:, 2] ** 2), eps)
    lnm2 = jnp.log(m2)
    h = jnp.stack([lnkt, lnz, lndelta, lnm2], axis=1)            # (B, 4, P)

    # embed: BN0 -> [Conv1d(k=1) -> BN -> GELU]* (last GELU removed), eval BN.
    h = (h - rm0[:, None]) / jnp.sqrt(rv0[:, None] + bn_eps) * g0[:, None] \
        + b0[:, None]
    nL = len(layers)
    for k, (W, bc, gm, bt, rm, rv) in enumerate(layers):
        h = jnp.einsum('oc,bcp->bop', W, h,
                       precision=jax.lax.Precision.HIGHEST) + bc[:, None]
        h = (h - rm[:, None]) / jnp.sqrt(rv[:, None] + bn_eps) * gm[:, None] \
            + bt[:, None]
        if k < nL - 1:
            h = 0.5 * h * (1.0 + jax.lax.erf(h / jnp.sqrt(jnp.float32(2.0))))

    out_dim = layers[-1][0].shape[0]
    y = jnp.zeros((B, out_dim, S, S), dtype=h.dtype)
    y = y.at[:, :, i, j].set(h)
    y = y.at[:, :, j, i].set(h)
    return y


# ----------------------------------------------------------------------------
# Deterministic synthetic parameters.
# ----------------------------------------------------------------------------
def make_params(key, in_dim, dims):
    keys = iter(jax.random.split(key, 4 + 6 * len(dims)))
    nrm = lambda shape: jax.random.normal(next(keys), shape, dtype=jnp.float32)
    g0 = 1.0 + 0.1 * nrm((in_dim,))
    b0 = 0.1 * nrm((in_dim,))
    rm0 = 0.1 * nrm((in_dim,))
    rv0 = 0.5 + 0.3 * jnp.abs(nrm((in_dim,)))
    layers, prev = [], in_dim
    for d in dims:
        W = 0.3 * nrm((d, prev))
        bc = 0.1 * nrm((d,))
        gm = 1.0 + 0.1 * nrm((d,))
        bt = 0.1 * nrm((d,))
        rm = 0.1 * nrm((d,))
        rv = 0.5 + 0.3 * jnp.abs(nrm((d,)))
        layers.append((W, bc, gm, bt, rm, rv))
        prev = d
    return (g0, b0, rm0, rv0), tuple(layers)


def _make_four_vectors(kx, km, B, S):
    # Physically plausible 4-vectors: E = sqrt(|p|^2 + m^2) so E > |pz|.
    p3 = 2.0 * jax.random.normal(kx, (B, 3, S), dtype=jnp.float32)
    mass = 0.1 + jnp.abs(jax.random.normal(km, (B, 1, S), dtype=jnp.float32))
    energy = jnp.sqrt(jnp.sum(p3 * p3, axis=1, keepdims=True) + mass * mass)
    return jnp.concatenate([p3, energy], axis=1)                 # (B, 4, S)


if __name__ == "__main__":
    B, S = 2, 8
    dims = (32, 32, 16)          # out_dim = 16

    key = jax.random.PRNGKey(0)
    kx, km, kp, kx2, km2 = jax.random.split(key, 5)
    x = _make_four_vectors(kx, km, B, S)
    params = make_params(kp, _NUM_FTS, dims)

    # 1) default f32 path (padded S=8 -> 128), tight check vs. module reference
    out = jax.block_until_ready(pair_embed(x, params))
    ref = jax.block_until_ready(pair_embed_ref(x, params))
    assert out.shape == (B, dims[-1], S, S), out.shape
    assert bool(jnp.all(jnp.isfinite(out)))
    max_err = float(jnp.max(jnp.abs(out - ref)))
    assert jnp.allclose(out, ref, atol=2e-2, rtol=2e-2), max_err

    # 2) bf16-MXU-operand path (v6e/v7x option); loose numeric sanity check
    out_bf16 = jax.block_until_ready(pair_embed(x, params, mxu_bf16=True))
    assert bool(jnp.all(jnp.isfinite(out_bf16)))
    assert jnp.allclose(out_bf16, ref, atol=1.0, rtol=1.5e-1)

    # 3) un-padded path (S % 128 == 0) exercising the larger tiles
    S2 = 256
    x2 = _make_four_vectors(kx2, km2, B, S2)
    out2 = jax.block_until_ready(pair_embed(x2, params))
    ref2 = jax.block_until_ready(pair_embed_ref(x2, params))
    assert out2.shape == (B, dims[-1], S2, S2), out2.shape
    assert bool(jnp.all(jnp.isfinite(out2)))
    max_err2 = float(jnp.max(jnp.abs(out2 - ref2)))
    assert jnp.allclose(out2, ref2, atol=2e-2, rtol=2e-2), max_err2

    print("KERNEL_OK")
</pallas_src>

<mosaic_0001>
module attributes {stable_mosaic.version = 11 : i64} {
  func.func @_pair_fts_kernel(%arg0: i32, %arg1: i32, %arg2: i32, %arg3: memref<1x128x7xf32, #tpu.memory_space<vmem>>, %arg4: memref<1x7x128xf32, #tpu.memory_space<vmem>>, %arg5: memref<1x4x128x128xf32, #tpu.memory_space<vmem>>) attributes {dimension_semantics = [#tpu.dimension_semantics<parallel>, #tpu.dimension_semantics<parallel>, #tpu.dimension_semantics<parallel>], iteration_bounds = array<i64: 2, 1, 1>, scalar_prefetch = 0 : i64, scratch_operands = 0 : i64, tpu.core_type = #tpu.core_type<tc>, window_params = [{transform_indices = @transform_0, window_bounds = array<i64: 1, 128, 7>}, {transform_indices = @transform_1, window_bounds = array<i64: 1, 7, 128>}, {transform_indices = @transform_2, window_bounds = array<i64: 1, 4, 128, 128>}]} {
    %c0 = arith.constant 0 : index
    %c0_0 = arith.constant 0 : index
    %c0_1 = arith.constant 0 : index
    %0 = vector.load %arg3[%c0, %c0_0, %c0_1] : memref<1x128x7xf32, #tpu.memory_space<vmem>>, vector<1x128x7xf32>
    %1 = vector.shape_cast %0 : vector<1x128x7xf32> to vector<128x7xf32>
    %c0_2 = arith.constant 0 : index
    %c0_3 = arith.constant 0 : index
    %c0_4 = arith.constant 0 : index
    %2 = vector.load %arg4[%c0_2, %c0_3, %c0_4] : memref<1x7x128xf32, #tpu.memory_space<vmem>>, vector<1x7x128xf32>
    %3 = vector.shape_cast %2 : vector<1x7x128xf32> to vector<7x128xf32>
    %4 = vector.extract_strided_slice %1 {offsets = [0, 0], sizes = [128, 1], strides = [1, 1]} : vector<128x7xf32> to vector<128x1xf32>
    %5 = vector.extract_strided_slice %1 {offsets = [0, 1], sizes = [128, 1], strides = [1, 1]} : vector<128x7xf32> to vector<128x1xf32>
    %6 = vector.extract_strided_slice %1 {offsets = [0, 2], sizes = [128, 1], strides = [1, 1]} : vector<128x7xf32> to vector<128x1xf32>
    %7 = vector.extract_strided_slice %1 {offsets = [0, 3], sizes = [128, 1], strides = [1, 1]} : vector<128x7xf32> to vector<128x1xf32>
    %8 = vector.extract_strided_slice %1 {offsets = [0, 4], sizes = [128, 1], strides = [1, 1]} : vector<128x7xf32> to vector<128x1xf32>
    %9 = vector.extract_strided_slice %1 {offsets = [0, 5], sizes = [128, 1], strides = [1, 1]} : vector<128x7xf32> to vector<128x1xf32>
    %10 = vector.extract_strided_slice %1 {offsets = [0, 6], sizes = [128, 1], strides = [1, 1]} : vector<128x7xf32> to vector<128x1xf32>
    %11 = vector.extract_strided_slice %3 {offsets = [0, 0], sizes = [1, 128], strides = [1, 1]} : vector<7x128xf32> to vector<1x128xf32>
    %12 = vector.extract_strided_slice %3 {offsets = [1, 0], sizes = [1, 128], strides = [1, 1]} : vector<7x128xf32> to vector<1x128xf32>
    %13 = vector.extract_strided_slice %3 {offsets = [2, 0], sizes = [1, 128], strides = [1, 1]} : vector<7x128xf32> to vector<1x128xf32>
    %14 = vector.extract_strided_slice %3 {offsets = [3, 0], sizes = [1, 128], strides = [1, 1]} : vector<7x128xf32> to vector<1x128xf32>
    %15 = vector.extract_strided_slice %3 {offsets = [4, 0], sizes = [1, 128], strides = [1, 1]} : vector<7x128xf32> to vector<1x128xf32>
    %16 = vector.extract_strided_slice %3 {offsets = [5, 0], sizes = [1, 128], strides = [1, 1]} : vector<7x128xf32> to vector<1x128xf32>
    %17 = vector.extract_strided_slice %3 {offsets = [6, 0], sizes = [1, 128], strides = [1, 1]} : vector<7x128xf32> to vector<1x128xf32>
    %18 = vector.broadcast %10 : vector<128x1xf32> to vector<128x128xf32>
    %19 = vector.broadcast %17 : vector<1x128xf32> to vector<128x128xf32>
    %20 = arith.subf %18, %19 : vector<128x128xf32>
    %cst = arith.constant 3.14159274 : f32
    %21 = vector.broadcast %cst : f32 to vector<128x128xf32>
    %22 = arith.addf %20, %21 : vector<128x128xf32>
    %cst_5 = arith.constant 0.159154937 : f32
    %23 = vector.broadcast %cst_5 : f32 to vector<128x128xf32>
    %24 = arith.mulf %22, %23 : vector<128x128xf32>
    %25 = math.floor %24 : vector<128x128xf32>
    %cst_6 = arith.constant 6.28318548 : f32
    %26 = vector.broadcast %cst_6 : f32 to vector<128x128xf32>
    %27 = arith.mulf %26, %25 : vector<128x128xf32>
    %28 = arith.subf %22, %27 : vector<128x128xf32>
    %cst_7 = arith.constant 3.14159274 : f32
    %29 = vector.broadcast %cst_7 : f32 to vector<128x128xf32>
    %30 = arith.subf %28, %29 : vector<128x128xf32>
    %31 = vector.broadcast %9 : vector<128x1xf32> to vector<128x128xf32>
    %32 = vector.broadcast %16 : vector<1x128xf32> to vector<128x128xf32>
    %33 = arith.subf %31, %32 : vector<128x128xf32>
    %34 = arith.mulf %33, %33 : vector<128x128xf32>
    %35 = arith.mulf %30, %30 : vector<128x128xf32>
    %36 = arith.addf %34, %35 : vector<128x128xf32>
    %37 = math.sqrt %36 : vector<128x128xf32>
    %cst_8 = arith.constant 9.99999993E-9 : f32
    %38 = vector.broadcast %cst_8 : f32 to vector<128x128xf32>
    %39 = arith.maximumf %37, %38 : vector<128x128xf32>
    %40 = math.log %39 : vector<128x128xf32>
    %41 = vector.broadcast %8 : vector<128x1xf32> to vector<128x128xf32>
    %42 = vector.broadcast %15 : vector<1x128xf32> to vector<128x128xf32>
    %43 = arith.minimumf %41, %42 : vector<128x128xf32>
    %44 = arith.mulf %43, %37 : vector<128x128xf32>
    %cst_9 = arith.constant 9.99999993E-9 : f32
    %45 = vector.broadcast %cst_9 : f32 to vector<128x128xf32>
    %46 = arith.maximumf %44, %45 : vector<128x128xf32>
    %47 = math.log %46 : vector<128x128xf32>
    %48 = vector.broadcast %8 : vector<128x1xf32> to vector<128x128xf32>
    %49 = vector.broadcast %15 : vector<1x128xf32> to vector<128x128xf32>
    %50 = arith.addf %48, %49 : vector<128x128xf32>
    %cst_10 = arith.constant 9.99999993E-9 : f32
    %51 = vector.broadcast %cst_10 : f32 to vector<128x128xf32>
    %52 = arith.maximumf %50, %51 : vector<128x128xf32>
    %53 = tpu.reciprocal %52 {approx = true} : vector<128x128xf32> -> vector<128x128xf32>
    %54 = arith.mulf %43, %53 : vector<128x128xf32>
    %cst_11 = arith.constant 9.99999993E-9 : f32
    %55 = vector.broadcast %cst_11 : f32 to vector<128x128xf32>
    %56 = arith.maximumf %54, %55 : vector<128x128xf32>
    %57 = math.log %56 : vector<128x128xf32>
    %58 = vector.broadcast %7 : vector<128x1xf32> to vector<128x128xf32>
    %59 = vector.broadcast %14 : vector<1x128xf32> to vector<128x128xf32>
    %60 = arith.addf %58, %59 : vector<128x128xf32>
    %61 = vector.broadcast %4 : vector<128x1xf32> to vector<128x128xf32>
    %62 = vector.broadcast %11 : vector<1x128xf32> to vector<128x128xf32>
    %63 = arith.addf %61, %62 : vector<128x128xf32>
    %64 = vector.broadcast %5 : vector<128x1xf32> to vector<128x128xf32>
    %65 = vector.broadcast %12 : vector<1x128xf32> to vector<128x128xf32>
    %66 = arith.addf %64, %65 : vector<128x128xf32>
    %67 = vector.broadcast %6 : vector<128x1xf32> to vector<128x128xf32>
    %68 = vector.broadcast %13 : vector<1x128xf32> to vector<128x128xf32>
    %69 = arith.addf %67, %68 : vector<128x128xf32>
    %70 = arith.mulf %60, %60 : vector<128x128xf32>
    %71 = arith.mulf %63, %63 : vector<128x128xf32>
    %72 = arith.mulf %66, %66 : vector<128x128xf32>
    %73 = arith.addf %71, %72 : vector<128x128xf32>
    %74 = arith.mulf %69, %69 : vector<128x128xf32>
    %75 = arith.addf %73, %74 : vector<128x128xf32>
    %76 = arith.subf %70, %75 : vector<128x128xf32>
    %cst_12 = arith.constant 9.99999993E-9 : f32
    %77 = vector.broadcast %cst_12 : f32 to vector<128x128xf32>
    %78 = arith.maximumf %76, %77 : vector<128x128xf32>
    %79 = math.log %78 : vector<128x128xf32>
    %c0_13 = arith.constant 0 : index
    %c0_14 = arith.constant 0 : index
    %c0_15 = arith.constant 0 : index
    %c0_16 = arith.constant 0 : index
    %80 = vector.load %arg5[%c0_13, %c0_14, %c0_15, %c0_16] : memref<1x4x128x128xf32, #tpu.memory_space<vmem>>, vector<1x1x128x128xf32>
    %81 = vector.shape_cast %80 : vector<1x1x128x128xf32> to vector<128x128xf32>
    %82 = vector.shape_cast %47 : vector<128x128xf32> to vector<1x1x128x128xf32>
    tpu.vector_store %arg5[%c0_13, %c0_14, %c0_15, %c0_16], %82 {strides = array<i32>} : memref<1x4x128x128xf32, #tpu.memory_space<vmem>>, vector<1x1x128x128xf32>,
    %c0_17 = arith.constant 0 : index
    %c1 = arith.constant 1 : index
    %c0_18 = arith.constant 0 : index
    %c0_19 = arith.constant 0 : index
    %83 = vector.load %arg5[%c0_17, %c1, %c0_18, %c0_19] : memref<1x4x128x128xf32, #tpu.memory_space<vmem>>, vector<1x1x128x128xf32>
    %84 = vector.shape_cast %83 : vector<1x1x128x128xf32> to vector<128x128xf32>
    %85 = vector.shape_cast %57 : vector<128x128xf32> to vector<1x1x128x128xf32>
    tpu.vector_store %arg5[%c0_17, %c1, %c0_18, %c0_19], %85 {strides = array<i32>} : memref<1x4x128x128xf32, #tpu.memory_space<vmem>>, vector<1x1x128x128xf32>,
    %c0_20 = arith.constant 0 : index
    %c2 = arith.constant 2 : index
    %c0_21 = arith.constant 0 : index
    %c0_22 = arith.constant 0 : index
    %86 = vector.load %arg5[%c0_20, %c2, %c0_21, %c0_22] : memref<1x4x128x128xf32, #tpu.memory_space<vmem>>, vector<1x1x128x128xf32>
    %87 = vector.shape_cast %86 : vector<1x1x128x128xf32> to vector<128x128xf32>
    %88 = vector.shape_cast %40 : vector<128x128xf32> to vector<1x1x128x128xf32>
    tpu.vector_store %arg5[%c0_20, %c2, %c0_21, %c0_22], %88 {strides = array<i32>} : memref<1x4x128x128xf32, #tpu.memory_space<vmem>>, vector<1x1x128x128xf32>,
    %c0_23 = arith.constant 0 : index
    %c3 = arith.constant 3 : index
    %c0_24 = arith.constant 0 : index
    %c0_25 = arith.constant 0 : index
    %89 = vector.load %arg5[%c0_23, %c3, %c0_24, %c0_25] : memref<1x4x128x128xf32, #tpu.memory_space<vmem>>, vector<1x1x128x128xf32>
    %90 = vector.shape_cast %89 : vector<1x1x128x128xf32> to vector<128x128xf32>
    %91 = vector.shape_cast %79 : vector<128x128xf32> to vector<1x1x128x128xf32>
    tpu.vector_store %arg5[%c0_23, %c3, %c0_24, %c0_25], %91 {strides = array<i32>} : memref<1x4x128x128xf32, #tpu.memory_space<vmem>>, vector<1x1x128x128xf32>,
    return
  }
  func.func @transform_0(%arg0: i32, %arg1: i32, %arg2: i32) -> (i32, i32, i32) {
    %c0_i32 = arith.constant 0 : i32
    %c0_i32_0 = arith.constant 0 : i32
    return %arg0, %arg1, %c0_i32 : i32, i32, i32
  }
  func.func @transform_1(%arg0: i32, %arg1: i32, %arg2: i32) -> (i32, i32, i32) {
    %c0_i32 = arith.constant 0 : i32
    %c0_i32_0 = arith.constant 0 : i32
    return %arg0, %c0_i32, %arg2 : i32, i32, i32
  }
  func.func @transform_2(%arg0: i32, %arg1: i32, %arg2: i32) -> (i32, i32, i32, i32) {
    %c0_i32 = arith.constant 0 : i32
    %c0_i32_0 = arith.constant 0 : i32
    return %arg0, %c0_i32, %arg1, %arg2 : i32, i32, i32, i32
  }
}

</mosaic_0001>

<bundles_post_ra>
// kernel: tpu_custom_call.1
= control target key start
LH: loop header
LB: loop body
LE: loop exit
PB: predicated region body
PF: predicated region fallthrough
CT: control target
= control target key end

     0   :  { %7 = vsyncpa [#allocation3], 0  ;;  %s3221_s0 = inlined_call_operand.vmem [shape: f32[2,128,7], index: 0, kind: input, shape index: {}]   ;;  %s3222_s1 = inlined_call_operand.vmem [shape: f32[2,7,128], index: 1, kind: input, shape index: {}]   ;;  %s3223_s2 = inlined_call_operand.hbm [shape: f32[2,4,128,128], index: 2, kind: output, shape index: {}]  }
   0x1   :  { %9 = vsyncpa [#allocation3 + $0x1], 0  ;;  %s2118_s9 = smov 0   ;;  %s2120_s10 = smov 0  }
   0x2   :  { %s2122_s11 = smov 0   ;;  %s2124_s12 = smov 0  }
   0x3   :  { %s2126_s13 = smov 0   ;;  %s2128_s14 = smov 0  }
   0x4 LB: > { %s1653_s15 = sadd.s32 4294967295, %s2091_s14   ;;  %s1654_s16 = sadd.s32 4294967294, %s2091_s14   ;;  %s2091_s14 = sphi %s2128_s14, %s15_s14   ;;  %s2087_s13 = sphi %s2126_s13, %s3234_s13   ;;  %s2083_s12 = sphi %s2124_s12, %s3233_s12   ;;  %s2079_s11 = sphi %s2122_s11, %s3232_s11   ;;  %s2075_s10 = sphi %s2120_s10, %s3231_s10   ;;  %s2071_s9 = sphi %s2118_s9, %s3230_s9  }
   0x5   : > { %s34_s17 = sadd.s32 1, %s2087_s13  ;;  %s101_s18 = sadd.s32 1, %s2079_s11 }
   0x6   : > { %p36_p0 = scmp.ge.s32.totalorder %s34_s17, 2  ;;  %p111_p1 = scmp.ne.s32.totalorder %s2079_s11, %s2075_s10 }
   0x7   : > { %p112_p2 = scmp.eq.s32.totalorder %s1653_s15, 1  ;;  %p117_p3 = scmp.ne.s32.totalorder %s2075_s10, %s2071_s9 }
   0x8   : > { %s3236_s17 = smov (%p36_p0, %s34_s17), 0  ;;  %p118_p5 = scmp.eq.s32.totalorder %s1654_s16, 1 }
   0x9   : > { %p2158_p4 = por %p112_p2, %p111_p1  ;;  %s94_s20 = ssub.s32 %s2087_s13, %s3236_s17 }
   0xa   : > { %p1657_p6 = scmp.ge.s32.totalorder %s2091_s14, 1  ;;  %p99_p7 = scmp.eq.s32.totalorder %s94_s20, 0 }
   0xb   : > { %p2165_p8 = por %p118_p5, %p117_p3  ;;  %p159_p9 = scmp.lt.s32.totalorder %s2091_s14, 3 }
   0xc   : > { %s2171_s22 = scalar_select %p99_p7, %s2079_s11, %s101_s18  }
   0xd   : > { %p160_p10 = pnand %p1657_p6, %p159_p9 }
   0xf   : > { %163 = sbr.rel (%p160_p10) target bundleno = 429 (0x1ad), region = 28 }
  0x14   : > { %p193_p11 = scmp.lt.s32.totalorder %s2083_s12, 1  ;;  %v2093_v0 = vmov 6   ;;  %v2094_v17 = vmov 5   ;;  %v2095_v18 = vmov 4   ;;  %v2096_v19 = vmov 3   ;;  %s189_s4 = sand.u32 1, %s2075_s10  }
  0x15   : > { %1798 = vset.pattern.permute.xlu1 %v2093_v0  ;;  %1797 = vset.pattern.permute.xlu0 %v2093_v0  ;;  %v307_v20 = vlaneseq  ;;  %v2097_v32 = vmov 0   ;;  %s2636_s5 = sshll.u32 %s189_s4, 9  ;;  %s1732_s7 = sshll.u32 %s2083_s12, 13 }
  0x16   : > { %s2175_s23 = scalar_select %p193_p11, %s2083_s12, 1 }
  0x17   : > { %v2288_v21 = vshrl.u32 %v307_v20, 7  ;;  %s2673_s6 = scalar_lea.vmem [#allocation2], %s2636_s5  ;;  %s3169_s18 = scalar_lea.hbm %s3223_s2, %s1732_s7 }
  0x18   : > { %s1731_s24 = sshll.u32 %s2175_s23, 7  ;;  %s1661_s28 = sshll.u32 %s2175_s23, 3 }
  0x19   : > { %s2181_s27 = scalar_lea.vmem %s3221_s0, %s1731_s24  ;;  %s2293_s3 = scalar_lea.vmem %s3222_s1, %s1661_s28  ;;  %v309_v22 = vsub.s32 6, %v2288_v21  ;;  %v489_v63 = vsub.s32 5, %v2288_v21 }
  0x1a   : > { %v2184_v1 = vld [vmem:[%s2181_s27 + $0x10] sm:$0xff]  ;;  %v2187_v2 = vld [vmem:[%s2181_s27] sm:$0xff]  ;;  %v2192_v3 = vld [vmem:[%s2181_s27 + $0x18] sm:$0xff]  ;;  %s1555_s8 = sshll.u32 %s2673_s6, 4  ;;  %s3176_s20 = scalar_lea.sflag [#allocation3], %s189_s4  ;;  %s3171_s8 = int_to_ptr.vmem [resolvable:$true] %s1555_s8 }
  0x1b   : > { %239 = vperm.xlu1 %1798, %v2184_v1   ;;  %229 = vperm.xlu0 %1797, %v2187_v2   ;;  %v2195_v4 = vld [vmem:[%s2181_s27 + $0x8] sm:$0xff]  ;;  %v2203_v6 = vld [vmem:[%s2181_s27 + $0x20] sm:$0xff]  ;;  %v2208_v7 = vld [vmem:[%s2181_s27 + $0x38] sm:$0xff]  ;;  %s2015_s23 = scalar_lea.vmem %s3171_s8, 8192  ;;  %s2100_s12 = smov [#allocation2]  }
  0x1c   : > { %v2200_v5 = vld [vmem:[%s2181_s27 + $0x28] sm:$0xff]  ;;  %v2211_v8 = vld [vmem:[%s2181_s27 + $0x30] sm:$0xff]  ;;  %v2219_v10 = vld [vmem:[%s2181_s27 + $0x40] sm:$0xff]  ;;  %p2016_p12 = scmp.ne.s32.totalorder %s3171_s8, %s2015_s23  ;;  %s2019_s24 = sshll.u32 %s2100_s12, 4  ;;  %s2020_s24 = int_to_ptr.vmem [resolvable:$false] %s2019_s24 }
  0x1d   : > { %v2216_v9 = vld [vmem:[%s2181_s27 + $0x48] sm:$0xff]  ;;  %v2224_v11 = vld [vmem:[%s2181_s27 + $0x58] sm:$0xff]  ;;  %v2227_v12 = vld [vmem:[%s2181_s27 + $0x50] sm:$0xff]  ;;  %s2021_s25 = scalar_lea.vmem %s2020_s24, 16384  ;;  %p2022_p1 = scmp.lt.s32.totalorder %s3171_s8, %s2020_s24 }
  0x1e   : > { %v2232_v13 = vld [vmem:[%s2181_s27 + $0x68] sm:$0xff]  ;;  %v2235_v14 = vld [vmem:[%s2181_s27 + $0x60] sm:$0xff]  ;;  %v2240_v15 = vld [vmem:[%s2181_s27 + $0x78] sm:$0xff]  ;;  %p2017_p13 = pnand %p2016_p12, %p2158_p4  ;;  %p2023_p2 = scmp.lt.s32.totalorder %s2021_s25, %s2015_s23 }
  0x1f   : > { %244 = vperm.xlu1 %1798, %v2192_v3   ;;  %234 = vperm.xlu0 %1797, %v2195_v4   ;;  %v2243_v16 = vld [vmem:[%s2181_s27 + $0x70] sm:$0xff]  ;;  %v2299_v23 = vld [vmem:[%s2293_s3] sm:$0x7f] }
  0x20   : > { %v2304_v24 = vrot.slane %v2299_v23, %v309_v22  ;;  %p2018_p0 = pneg %p2017_p13  ;;  %p2024_p3 = por %p2023_p2, %p2022_p1 }
  0x22   : > { %p2025_p5 = pnand %p2024_p3, %p2018_p0 }
  0x23   : > { %254 = vperm.xlu1 %1798, %v2200_v5   ;;  %249 = vperm.xlu0 %1797, %v2203_v6  }
  0x27   : > { %264 = vperm.xlu1 %1798, %v2208_v7   ;;  %259 = vperm.xlu0 %1797, %v2211_v8  }
  0x2b   : > { %274 = vperm.xlu1 %1798, %v2216_v9   ;;  %269 = vperm.xlu0 %1797, %v2219_v10  }
  0x2f   : > { %284 = vperm.xlu1 %1798, %v2224_v11   ;;  %279 = vperm.xlu0 %1797, %v2227_v12  }
  0x33   : > { %294 = vperm.xlu1 %1798, %v2232_v13   ;;  %289 = vperm.xlu0 %1797, %v2235_v14  }
  0x37   : > { %304 = vperm.xlu1 %1798, %v2240_v15   ;;  %299 = vperm.xlu0 %1797, %v2243_v16  }
  0x3b   : > { %1800 = vset.pattern.permute.xlu1 %v2094_v17  ;;  %1799 = vset.pattern.permute.xlu0 %v2094_v17 }
  0x3c   : > { %428 = vperm.xlu1 %1800, %v2195_v4   ;;  %424 = vperm.xlu0 %1799, %v2187_v2  }
  0x40   : > { %432 = vperm.xlu1 %1800, %v2184_v1   ;;  %436 = vperm.xlu0 %1799, %v2192_v3  }
  0x44   : > { %440 = vperm.xlu1 %1800, %v2203_v6   ;;  %444 = vperm.xlu0 %1799, %v2200_v5  }
  0x48   : > { %448 = vperm.xlu1 %1800, %v2211_v8   ;;  %452 = vperm.xlu0 %1799, %v2208_v7  }
  0x4c   : > { %456 = vperm.xlu1 %1800, %v2219_v10   ;;  %460 = vperm.xlu0 %1799, %v2216_v9  }
  0x50   : > { %464 = vperm.xlu1 %1800, %v2227_v12   ;;  %468 = vperm.xlu0 %1799, %v2224_v11  }
  0x54   : > { %472 = vperm.xlu1 %1800, %v2235_v14   ;;  %476 = vperm.xlu0 %1799, %v2232_v13  }
  0x58   : > { %480 = vperm.xlu1 %1800, %v2243_v16   ;;  %484 = vperm.xlu0 %1799, %v2240_v15  }
  0x5c   : > { %1801 = vset.pattern.permute.xlu1 %v2095_v18  ;;  %1802 = vset.pattern.permute.xlu0 %v2095_v18 }
  0x5d   : > { %716 = vperm.xlu1 %1801, %v2187_v2   ;;  %720 = vperm.xlu0 %1802, %v2195_v4  }
  0x61   : > { %724 = vperm.xlu1 %1801, %v2184_v1   ;;  %732 = vperm.xlu0 %1802, %v2203_v6  }
  0x65   : > { %728 = vperm.xlu1 %1801, %v2192_v3   ;;  %740 = vperm.xlu0 %1802, %v2211_v8  }
  0x69   : > { %736 = vperm.xlu1 %1801, %v2200_v5   ;;  %748 = vperm.xlu0 %1802, %v2219_v10  }
  0x6d   : > { %744 = vperm.xlu1 %1801, %v2208_v7   ;;  %756 = vperm.xlu0 %1802, %v2227_v12  }
  0x71   : > { %752 = vperm.xlu1 %1801, %v2216_v9   ;;  %764 = vperm.xlu0 %1802, %v2235_v14  }
  0x75   : > { %760 = vperm.xlu1 %1801, %v2224_v11   ;;  %772 = vperm.xlu0 %1802, %v2243_v16  }
  0x79   : > { %768 = vperm.xlu1 %1801, %v2232_v13   ;;  %1803 = vset.pattern.permute.xlu0 %v2096_v19 }
  0x7a   : > { %976 = vperm.xlu0 %1803, %v2187_v2  }
  0x7d   : > { %776 = vperm.xlu1 %1801, %v2240_v15  }
  0x7e   : > { %988 = vperm.xlu0 %1803, %v2192_v3  }
  0x81   : > { %1804 = vset.pattern.permute.xlu1 %v2096_v19 }
  0x82   : > { %980 = vperm.xlu1 %1804, %v2195_v4   ;;  %996 = vperm.xlu0 %1803, %v2200_v5  }
  0x86   : > { %984 = vperm.xlu1 %1804, %v2184_v1   ;;  %1004 = vperm.xlu0 %1803, %v2208_v7  }
  0x8a   : > { %992 = vperm.xlu1 %1804, %v2203_v6   ;;  %1012 = vperm.xlu0 %1803, %v2216_v9  }
  0x8e   : > { %1000 = vperm.xlu1 %1804, %v2211_v8   ;;  %1020 = vperm.xlu0 %1803, %v2224_v11  }
  0x92   : > { %1008 = vperm.xlu1 %1804, %v2219_v10   ;;  %1028 = vperm.xlu0 %1803, %v2232_v13  }
  0x96   : > { %v240_v25 = vpop.permute.xlu1 %239  ;;  %1016 = vperm.xlu1 %1804, %v2227_v12   ;;  %1036 = vperm.xlu0 %1803, %v2240_v15   ;;  %v230_v26 = vpop.permute.xlu0 %229 }
  0x97   : > { %v313_v27 = vsub.f32 %v240_v25, %v2304_v24  ;;  %v311_v28 = vsub.f32 %v230_v26, %v2304_v24 }
  0x99   : > { %v2310_v29 = vadd.f32 3.1415927, %v313_v27  ;;  %v2312_v30 = vadd.f32 3.1415927, %v311_v28 }
  0x9a   : > { %v245_v31 = vpop.permute.xlu1 %244  ;;  %1024 = vperm.xlu1 %1804, %v2235_v14   ;;  %1806 = vset.pattern.permute.xlu0 %v2097_v32  ;;  %v235_v33 = vpop.permute.xlu0 %234 }
  0x9b   : > { %v345_v34 = vmul.f32 0.15915494, %v2310_v29  ;;  %v343_v35 = vmul.f32 0.15915494, %v2312_v30  ;;  %v314_v36 = vsub.f32 %v245_v31, %v2304_v24  ;;  %v312_v37 = vsub.f32 %v235_v33, %v2304_v24  ;;  %1064 = vperm.xlu0 %1806, %v2195_v4  }
  0x9c   : > { %v781_v31 = vsub.s32 4, %v2288_v21 }
  0x9d   : > { %v2320_v38 = vadd.f32 3.1415927, %v314_v36  ;;  %v2322_v39 = vadd.f32 3.1415927, %v312_v37  ;;  %v361_v40 = vfloor.f32 %v345_v34  ;;  %v359_v43 = vfloor.f32 %v343_v35 }
  0x9e   : > { %v255_v41 = vpop.permute.xlu1 %254  ;;  %1032 = vperm.xlu1 %1804, %v2243_v16   ;;  %v250_v42 = vpop.permute.xlu0 %249 }
  0x9f   : > { %v346_v44 = vmul.f32 0.15915494, %v2320_v38  ;;  %v316_v45 = vsub.f32 %v255_v41, %v2304_v24  ;;  %1076 = vperm.xlu0 %1806, %v2203_v6   ;;  %v344_v46 = vmul.f32 0.15915494, %v2322_v39  ;;  %v315_v47 = vsub.f32 %v250_v42, %v2304_v24 }
  0xa0   : > { %v377_v50 = vmul.f32 6.2831855, %v361_v40  ;;  %v375_v55 = vmul.f32 6.2831855, %v359_v43  ;;  %v2361_v41 = vrot.slane %v2299_v23, %v489_v63 }
  0xa1   : > { %v362_v48 = vfloor.f32 %v346_v44  ;;  %v2330_v49 = vadd.f32 3.1415927, %v316_v45  ;;  %v360_v51 = vfloor.f32 %v344_v46  ;;  %v2332_v52 = vadd.f32 3.1415927, %v315_v47 }
  0xa2   : > { %v265_v53 = vpop.permute.xlu1 %264  ;;  %1805 = vset.pattern.permute.xlu1 %v2097_v32  ;;  %v260_v54 = vpop.permute.xlu0 %259  ;;  %v393_v0 = vsub.f32 %v2310_v29, %v377_v50  ;;  %v391_v25 = vsub.f32 %v2312_v30, %v375_v55  ;;  %v2369_v46 = vrot.slane %v2299_v23, %v781_v31 }
  0xa3   : > { %v318_v56 = vsub.f32 %v265_v53, %v2304_v24  ;;  %1060 = vperm.xlu1 %1805, %v2187_v2   ;;  %1084 = vperm.xlu0 %1806, %v2211_v8   ;;  %v378_v57 = vmul.f32 6.2831855, %v362_v48  ;;  %v348_v58 = vmul.f32 0.15915494, %v2330_v49  ;;  %v347_v59 = vmul.f32 0.15915494, %v2332_v52 }
  0xa4   : > { %v317_v60 = vsub.f32 %v260_v54, %v2304_v24  ;;  %v376_v61 = vmul.f32 6.2831855, %v360_v51  ;;  %v1664_v42 = vadd.f32 -3.1415927, %v393_v0  ;;  %v1662_v43 = vadd.f32 -3.1415927, %v391_v25 }
  0xa5   : > { %v2340_v62 = vadd.f32 3.1415927, %v318_v56  ;;  %v364_v17 = vfloor.f32 %v348_v58  ;;  %v363_v18 = vfloor.f32 %v347_v59  ;;  %v394_v29 = vsub.f32 %v2320_v38, %v378_v57 }
  0xa6   : > { %v2344_v19 = vadd.f32 3.1415927, %v317_v60  ;;  %v275_v20 = vpop.permute.xlu1 %274  ;;  %v270_v22 = vpop.permute.xlu0 %269  ;;  %v392_v32 = vsub.f32 %v2322_v39, %v376_v61  ;;  %v2378_v59 = vmul.f32 %v1664_v42, %v1664_v42 }
  0xa7   : > { %v350_v26 = vmul.f32 0.15915494, %v2340_v62  ;;  %v320_v27 = vsub.f32 %v275_v20, %v2304_v24  ;;  %v319_v28 = vsub.f32 %v270_v22, %v2304_v24  ;;  %1068 = vperm.xlu1 %1805, %v2184_v1   ;;  %1092 = vperm.xlu0 %1806, %v2219_v10   ;;  %v380_v33 = vmul.f32 6.2831855, %v364_v17 }
  0xa8   : > { %v379_v34 = vmul.f32 6.2831855, %v363_v18  ;;  %v349_v30 = vmul.f32 0.15915494, %v2344_v19  ;;  %v1665_v47 = vadd.f32 -3.1415927, %v394_v29 }
  0xa9   : > { %v2355_v35 = vadd.f32 3.1415927, %v320_v27  ;;  %v2358_v36 = vadd.f32 3.1415927, %v319_v28  ;;  %v366_v38 = vfloor.f32 %v350_v26  ;;  %v1663_v48 = vadd.f32 -3.1415927, %v392_v32 }
  0xaa   : > { %v285_v37 = vpop.permute.xlu1 %284  ;;  %v280_v40 = vpop.permute.xlu0 %279  ;;  %v396_v50 = vsub.f32 %v2330_v49, %v380_v33  ;;  %v395_v51 = vsub.f32 %v2332_v52, %v379_v34  ;;  %v365_v53 = vfloor.f32 %v349_v30  ;;  %v2382_v49 = vmul.f32 %v1662_v43, %v1662_v43 }
  0xab   : > { %v352_v44 = vmul.f32 0.15915494, %v2355_v35  ;;  %1072 = vperm.xlu1 %1805, %v2192_v3   ;;  %1100 = vperm.xlu0 %1806, %v2227_v12   ;;  %v322_v39 = vsub.f32 %v285_v37, %v2304_v24  ;;  %v321_v45 = vsub.f32 %v280_v40, %v2304_v24  ;;  %v351_v54 = vmul.f32 0.15915494, %v2358_v36 }
  0xac   : > { %v382_v60 = vmul.f32 6.2831855, %v366_v38  ;;  %v524_v17 = vmul.f32 %v1663_v48, %v1663_v48  ;;  %v1667_v18 = vadd.f32 -3.1415927, %v396_v50  ;;  %v1666_v20 = vadd.f32 -3.1415927, %v395_v51 }
  0xad   : > { %v2374_v55 = vadd.f32 3.1415927, %v322_v39  ;;  %v2376_v56 = vadd.f32 3.1415927, %v321_v45  ;;  %v368_v23 = vfloor.f32 %v352_v44  ;;  %v2388_v22 = vmul.f32 %v1665_v47, %v1665_v47 }
  0xae   : > { %v295_v57 = vpop.permute.xlu1 %294  ;;  %v290_v58 = vpop.permute.xlu0 %289  ;;  %v381_v25 = vmul.f32 6.2831855, %v365_v53  ;;  %v367_v26 = vfloor.f32 %v351_v54  ;;  %v398_v32 = vsub.f32 %v2340_v62, %v382_v60  ;;  %v2405_v62 = vmul.f32 %v1666_v20, %v1666_v20 }
  0xaf   : > { %1080 = vperm.xlu1 %1805, %v2200_v5   ;;  %1108 = vperm.xlu0 %1806, %v2235_v14   ;;  %v354_v52 = vmul.f32 0.15915494, %v2374_v55  ;;  %v353_v61 = vmul.f32 0.15915494, %v2376_v56  ;;  %v324_v63 = vsub.f32 %v295_v57, %v2304_v24  ;;  %v323_v0 = vsub.f32 %v290_v58, %v2304_v24 }
  0xb0   : > { %v384_v30 = vmul.f32 6.2831855, %v368_v23  ;;  %v397_v39 = vsub.f32 %v2344_v19, %v381_v25  ;;  %v2408_v47 = vmul.f32 %v1667_v18, %v1667_v18  ;;  %v1669_v48 = vadd.f32 -3.1415927, %v398_v32 }
  0xb1   : > { %v2390_v27 = vadd.f32 3.1415927, %v324_v63  ;;  %v2392_v28 = vadd.f32 3.1415927, %v323_v0  ;;  %v370_v37 = vfloor.f32 %v354_v52  ;;  %v369_v40 = vfloor.f32 %v353_v61 }
  0xb2   : > { %v305_v29 = vpop.permute.xlu1 %304  ;;  %v300_v31 = vpop.permute.xlu0 %299  ;;  %v2098_v57 = vmov 1   ;;  %v400_v60 = vsub.f32 %v2355_v35, %v384_v30  ;;  %v1668_v20 = vadd.f32 -3.1415927, %v397_v39  ;;  %v2420_v30 = vmul.f32 %v1669_v48, %v1669_v48 }
  0xb3   : > { %v326_v33 = vsub.f32 %v305_v29, %v2304_v24  ;;  %v325_v34 = vsub.f32 %v300_v31, %v2304_v24  ;;  %1088 = vperm.xlu1 %1805, %v2208_v7   ;;  %1116 = vperm.xlu0 %1806, %v2243_v16   ;;  %v356_v42 = vmul.f32 0.15915494, %v2390_v27  ;;  %v355_v43 = vmul.f32 0.15915494, %v2392_v28 }
  0xb4   : > { %v383_v24 = vmul.f32 6.2831855, %v367_v26  ;;  %v386_v19 = vmul.f32 6.2831855, %v370_v37  ;;  %v385_v23 = vmul.f32 6.2831855, %v369_v40 }
  0xb5   : > { %v2401_v38 = vadd.f32 3.1415927, %v326_v33  ;;  %v2403_v44 = vadd.f32 3.1415927, %v325_v34  ;;  %v372_v45 = vfloor.f32 %v356_v42  ;;  %v371_v50 = vfloor.f32 %v355_v43 }
  0xb6   : > { %v399_v25 = vsub.f32 %v2358_v36, %v383_v24  ;;  %v402_v36 = vsub.f32 %v2374_v55, %v386_v19  ;;  %v401_v43 = vsub.f32 %v2376_v56, %v385_v23 }
  0xb7   : > { %v358_v51 = vmul.f32 0.15915494, %v2401_v38  ;;  %v357_v53 = vmul.f32 0.15915494, %v2403_v44  ;;  %v429_v54 = vpop.permute.xlu1 %428  ;;  %1096 = vperm.xlu1 %1805, %v2216_v9   ;;  %1807 = vset.pattern.permute.xlu0 %v2098_v57  ;;  %v425_v58 = vpop.permute.xlu0 %424  ;;  %v388_v61 = vmul.f32 6.2831855, %v372_v45 }
  0xb8   : > { %v492_v52 = vsub.f32 %v429_v54, %v2361_v41  ;;  %1144 = vperm.xlu0 %1807, %v2187_v2   ;;  %v491_v18 = vsub.f32 %v425_v58, %v2361_v41  ;;  %v387_v26 = vmul.f32 6.2831855, %v371_v50  ;;  %v1671_v2 = vadd.f32 -3.1415927, %v400_v60 }
  0xb9   : > { %v374_v63 = vfloor.f32 %v358_v51  ;;  %v373_v0 = vfloor.f32 %v357_v53  ;;  %v404_v39 = vsub.f32 %v2390_v27, %v388_v61  ;;  %v1670_v50 = vadd.f32 -3.1415927, %v399_v25 }
  0xba   : > { %v508_v29 = vmul.f32 %v492_v52, %v492_v52  ;;  %v507_v33 = vmul.f32 %v491_v18, %v491_v18  ;;  %v403_v45 = vsub.f32 %v2392_v28, %v387_v26  ;;  %v529_v58 = vmul.f32 %v1668_v20, %v1668_v20 }
  0xbb   : > { %v390_v31 = vmul.f32 6.2831855, %v374_v63  ;;  %v389_v32 = vmul.f32 6.2831855, %v373_v0  ;;  %v433_v35 = vpop.permute.xlu1 %432  ;;  %1104 = vperm.xlu1 %1805, %v2224_v11   ;;  %v437_v34 = vpop.permute.xlu0 %436  ;;  %v1675_v54 = vadd.f32 -3.1415927, %v404_v39  ;;  %v532_v26 = vmul.f32 %v1671_v2, %v1671_v2 }
  0xbc   : > { %v2422_v37 = vadd.f32 %v524_v17, %v508_v29  ;;  %v493_v40 = vsub.f32 %v433_v35, %v2361_v41  ;;  %v494_v42 = vsub.f32 %v437_v34, %v2361_v41  ;;  %1156 = vperm.xlu0 %1807, %v2192_v3   ;;  %v2431_v24 = vadd.f32 %v2382_v49, %v507_v33 }
  0xbd   : > { %v406_v51 = vsub.f32 %v2401_v38, %v390_v31  ;;  %v405_v3 = vsub.f32 %v2403_v44, %v389_v32  ;;  %v1673_v38 = vadd.f32 -3.1415927, %v402_v36  ;;  %v1672_v44 = vadd.f32 -3.1415927, %v401_v43 }
  0xbe   : > { %1811 = vrsqrt.f32 %v2422_v37  ;;  %v509_v17 = vmul.f32 %v493_v40, %v493_v40  ;;  %v510_v48 = vmul.f32 %v494_v42, %v494_v42  ;;  %v1674_v60 = vadd.f32 -3.1415927, %v403_v45 }
  0xbf   : > { %1813 = vrsqrt.f32 %v2431_v24  ;;  %v441_v55 = vpop.permute.xlu1 %440  ;;  %1112 = vperm.xlu1 %1805, %v2232_v13   ;;  %v445_v56 = vpop.permute.xlu0 %444  ;;  %v1677_v52 = vadd.f32 -3.1415927, %v406_v51  ;;  %v1676_v61 = vadd.f32 -3.1415927, %v405_v3  ;;  %v2460_v25 = vmul.f32 %v1672_v44, %v1672_v44 }
  0xc0   : > { %v2440_v49 = vadd.f32 %v2378_v59, %v509_v17  ;;  %v2443_v27 = vadd.f32 %v2388_v22, %v510_v48  ;;  %v495_v28 = vsub.f32 %v441_v55, %v2361_v41  ;;  %v496_v53 = vsub.f32 %v445_v56, %v2361_v41  ;;  %1164 = vperm.xlu0 %1807, %v2200_v5  }
  0xc1   : > { %v531_v59 = vmul.f32 %v1670_v50, %v1670_v50  ;;  %v2462_v29 = vmul.f32 %v1673_v38, %v1673_v38  ;;  %v2464_v31 = vmul.f32 %v1675_v54, %v1675_v54  ;;  %v2466_v32 = vmul.f32 %v1674_v60, %v1674_v60 }
  0xc2   : > { %1815 = vrsqrt.f32 %v2440_v49  ;;  %v511_v19 = vmul.f32 %v495_v28, %v495_v28  ;;  %v512_v23 = vmul.f32 %v496_v53, %v496_v53  ;;  %v2469_v33 = vmul.f32 %v1676_v61, %v1676_v61 }
  0xc3   : > { %1817 = vrsqrt.f32 %v2443_v27  ;;  %v449_v22 = vpop.permute.xlu1 %448  ;;  %1120 = vperm.xlu1 %1805, %v2240_v15   ;;  %v453_v63 = vpop.permute.xlu0 %452  ;;  %v2473_v34 = vmul.f32 %v1677_v52, %v1677_v52  ;;  %vm557_vm0 = vcmp.eq.f32.partialorder %v2431_v24, inf  ;;  %vm559_vm1 = vcmp.eq.f32.partialorder %v2431_v24, 0.0 }
  0xc4   : > { %v2452_v5 = vadd.f32 %v2405_v62, %v511_v19  ;;  %v2455_v0 = vadd.f32 %v2408_v47, %v512_v23  ;;  %v497_v18 = vsub.f32 %v449_v22, %v2361_v41  ;;  %v498_v20 = vsub.f32 %v453_v63, %v2361_v41  ;;  %1172 = vperm.xlu0 %1807, %v2208_v7  }
  0xc5   : > { %v560_v36 = vand.u32 2147483648, %v2431_v24  ;;  %vm564_vm2 = vcmp.eq.f32.partialorder %v2422_v37, inf  ;;  %vm566_vm3 = vcmp.eq.f32.partialorder %v2422_v37, 0.0  ;;  %vm571_vm4 = vcmp.eq.f32.partialorder %v2440_v49, inf }
  0xc6   : > { %1819 = vrsqrt.f32 %v2452_v5  ;;  %v513_v62 = vmul.f32 %v497_v18, %v497_v18  ;;  %v514_v47 = vmul.f32 %v498_v20, %v498_v20  ;;  %v588_v51 = vand.u32 2147483648, %v2452_v5 }
  0xc7   : > { %1821 = vrsqrt.f32 %v2455_v0  ;;  %v457_v35 = vpop.permute.xlu1 %456  ;;  %1808 = vset.pattern.permute.xlu1 %v2098_v57  ;;  %v461_v7 = vpop.permute.xlu0 %460  ;;  %v567_v57 = vand.u32 2147483648, %v2422_v37  ;;  %vm578_vm5 = vcmp.eq.f32.partialorder %v2443_v27, inf  ;;  %vm573_vm6 = vcmp.eq.f32.partialorder %v2440_v49, 0.0 }
  0xc8   : > { %v2476_v2 = vadd.f32 %v529_v58, %v513_v62  ;;  %v499_v40 = vsub.f32 %v457_v35, %v2361_v41  ;;  %v500_v42 = vsub.f32 %v461_v7, %v2361_v41  ;;  %1148 = vperm.xlu1 %1808, %v2195_v4   ;;  %v2484_v43 = vadd.f32 %v2420_v30, %v514_v47 }
  0xc9   : > { %1180 = vperm.xlu0 %1807, %v2216_v9   ;;  %v574_v30 = vand.u32 2147483648, %v2440_v49  ;;  %v581_v9 = vand.u32 2147483648, %v2443_v27  ;;  %vm580_vm7 = vcmp.eq.f32.partialorder %v2443_v27, 0.0  ;;  %v595_v54 = vand.u32 2147483648, %v2455_v0 }
  0xca   : > { %1823 = vrsqrt.f32 %v2476_v2  ;;  %v515_v39 = vmul.f32 %v499_v40, %v499_v40  ;;  %v516_v45 = vmul.f32 %v500_v42, %v500_v42  ;;  %vm585_vm8 = vcmp.eq.f32.partialorder %v2452_v5, inf }
  0xcb   : > { %v1812_v17 = vpop.eup %1811  ;;  %v465_v48 = vpop.permute.xlu1 %464  ;;  %1825 = vrsqrt.f32 %v2484_v43  ;;  %vm587_vm9 = vcmp.eq.f32.partialorder %v2452_v5, 0.0  ;;  %v609_v61 = vand.u32 2147483648, %v2484_v43  ;;  %vm592_vm10 = vcmp.eq.f32.partialorder %v2455_v0, inf }
  0xcc   : > { %v469_v50 = vpop.permute.xlu0 %468  ;;  %v1814_v3 = vpop.eup %1813  ;;  %v2496_v55 = vadd.f32 %v531_v59, %v515_v39  ;;  %v2498_v56 = vadd.f32 %v532_v26, %v516_v45  ;;  %v501_v28 = vsub.f32 %v465_v48, %v2361_v41  ;;  %1152 = vperm.xlu1 %1808, %v2184_v1   ;;  %v563_v44 = vmul.f32 %v1812_v17, %v2422_v37 }
  0xcd   : > { %v502_v53 = vsub.f32 %v469_v50, %v2361_v41  ;;  %1188 = vperm.xlu0 %1807, %v2224_v11   ;;  %v556_v38 = vmul.f32 %v1814_v3, %v2431_v24  ;;  %v602_v1 = vand.u32 2147483648, %v2476_v2  ;;  %vm599_vm11 = vcmp.eq.f32.partialorder %v2476_v2, inf }
  0xce   : > { %1827 = vrsqrt.f32 %v2496_v55  ;;  %v517_v58 = vmul.f32 %v501_v28, %v501_v28  ;;  %v565_v52 = vsel %vm564_vm2, %v2422_v37, %v563_v44  ;;  %vm594_vm12 = vcmp.eq.f32.partialorder %v2455_v0, 0.0 }
  0xcf   : > { %v518_v60 = vmul.f32 %v502_v53, %v502_v53  ;;  %v1816_v19 = vpop.eup %1815  ;;  %1829 = vrsqrt.f32 %v2498_v56  ;;  %v473_v23 = vpop.permute.xlu1 %472  ;;  %v558_v11 = vsel %vm557_vm0, %v2431_v24, %v556_v38  ;;  %v568_v47 = vsel %vm566_vm3, %v567_v57, %v565_v52 }
  0xd0   : > { %v477_v59 = vpop.permute.xlu0 %476  ;;  %v1818_v22 = vpop.eup %1817  ;;  %v2523_v63 = vadd.f32 %v2460_v25, %v517_v58  ;;  %v503_v20 = vsub.f32 %v473_v23, %v2361_v41  ;;  %1160 = vperm.xlu1 %1808, %v2203_v6   ;;  %v561_v62 = vsel %vm559_vm1, %v560_v36, %v558_v11  ;;  %v570_v25 = vmul.f32 %v1816_v19, %v2440_v49 }
  0xd1   : > { %v2526_v18 = vadd.f32 %v2462_v29, %v518_v60  ;;  %v504_v26 = vsub.f32 %v477_v59, %v2361_v41  ;;  %1196 = vperm.xlu0 %1807, %v2232_v13   ;;  %v577_v35 = vmul.f32 %v1818_v22, %v2443_v27  ;;  %v667_v40 = vmax.f32 %v561_v62, 1e-08 }
  0xd2   : > { %1831 = vrsqrt.f32 %v2523_v63  ;;  %v519_v29 = vmul.f32 %v503_v20, %v503_v20  ;;  %v668_v36 = vmax.f32 %v568_v47, 1e-08  ;;  %v572_v37 = vsel %vm571_vm4, %v2440_v49, %v570_v25 }
  0xd3   : > { %v520_v7 = vmul.f32 %v504_v26, %v504_v26  ;;  %v1820_v42 = vpop.eup %1819  ;;  %1833 = vrsqrt.f32 %v2526_v18  ;;  %v481_v13 = vpop.permute.xlu1 %480  ;;  %v579_v57 = vsel %vm578_vm5, %v2443_v27, %v577_v35  ;;  %v575_v3 = vsel %vm573_vm6, %v574_v30, %v572_v37 }
  0xd4   : > { %v485_v24 = vpop.permute.xlu0 %484  ;;  %v1822_v39 = vpop.eup %1821  ;;  %v2550_v45 = vadd.f32 %v2466_v32, %v519_v29  ;;  %v505_v48 = vsub.f32 %v481_v13, %v2361_v41  ;;  %1168 = vperm.xlu1 %1808, %v2211_v8   ;;  %1835 = vlog2.f32 %v667_v40  ;;  %v584_v32 = vmul.f32 %v1820_v42, %v2452_v5 }
  0xd5   : > { %v2553_v17 = vadd.f32 %v2464_v31, %v520_v7  ;;  %v506_v50 = vsub.f32 %v485_v24, %v2361_v41  ;;  %1204 = vperm.xlu0 %1807, %v2240_v15   ;;  %v2568_v31 = vsel %vm580_vm7, %v581_v9, %v579_v57  ;;  %v669_v53 = vmax.f32 %v575_v3, 1e-08 }
  0xd6   : > { %1837 = vrsqrt.f32 %v2550_v45  ;;  %v521_v41 = vmul.f32 %v505_v48, %v505_v48  ;;  %vm601_vm13 = vcmp.eq.f32.partialorder %v2476_v2, 0.0  ;;  %v586_v49 = vsel %vm585_vm8, %v2452_v5, %v584_v32 }
  0xd7   : > { %v522_v28 = vmul.f32 %v506_v50, %v506_v50  ;;  %v1824_v15 = vpop.eup %1823  ;;  %1839 = vrsqrt.f32 %v2553_v17  ;;  %v670_v30 = vmax.f32 %v2568_v31, 1e-08  ;;  %v591_v27 = vmul.f32 %v1822_v39, %v2455_v0 }
  0xd8   : > { %v2579_v9 = vadd.f32 %v2469_v33, %v521_v41  ;;  %1176 = vperm.xlu1 %1808, %v2219_v10   ;;  %v717_v44 = vpop.permute.xlu1 %716  ;;  %1841 = vlog2.f32 %v668_v36  ;;  %v721_v58 = vpop.permute.xlu0 %720  ;;  %v589_v60 = vsel %vm587_vm9, %v588_v51, %v586_v49  ;;  %v2099_v33 = vmov 2  }
  0xd9   : > { %v2582_v38 = vadd.f32 %v2473_v34, %v522_v28  ;;  %v2590_v19 = vmin.f32 %v717_v44, %v2369_v46  ;;  %v863_v23 = vadd.f32 %v2369_v46, %v717_v44  ;;  %1810 = vset.pattern.permute.xlu0 %v2099_v33  ;;  %v2595_v34 = vmin.f32 %v721_v58, %v2369_v46  ;;  %v2598_v11 = vpop.eup %1825 }
  0xda   : > { %v864_v59 = vadd.f32 %v2369_v46, %v721_v58  ;;  %1843 = vrsqrt.f32 %v2579_v9  ;;  %1232 = vperm.xlu0 %1810, %v2195_v4   ;;  %v671_v5 = vmax.f32 %v589_v60, 1e-08  ;;  %v598_v51 = vmul.f32 %v1824_v15, %v2476_v2 }
  0xdb   : > { %v593_v52 = vsel %vm592_vm10, %v2455_v0, %v591_v27  ;;  %v1828_v22 = vpop.eup %1827  ;;  %1845 = vrsqrt.f32 %v2582_v38  ;;  %v799_v20 = vmul.f32 %v2590_v19, %v561_v62  ;;  %v879_v26 = vmax.f32 %v863_v23, 1e-08 }
  0xdc   : > { %v800_v25 = vmul.f32 %v2595_v34, %v568_v47  ;;  %v2609_v35 = vpop.eup %1829  ;;  %v880_v29 = vmax.f32 %v864_v59, 1e-08  ;;  %1184 = vperm.xlu1 %1808, %v2227_v12   ;;  %1847 = vlog2.f32 %v669_v53  ;;  %v725_v4 = vpop.permute.xlu1 %724  ;;  %v600_v40 = vsel %vm599_vm11, %v2476_v2, %v598_v51 }
  0xdd   : > { %v733_v7 = vpop.permute.xlu0 %732  ;;  %v2620_v62 = vsel %vm594_vm12, %v595_v54, %v593_v52  ;;  %v815_v47 = vmax.f32 %v799_v20, 1e-08  ;;  %1849 = vrcp.f32 %v879_v26  ;;  %v2623_v13 = vmin.f32 %v725_v4, %v2369_v46 }
  0xde   : > { %v816_v42 = vmax.f32 %v800_v25, 1e-08  ;;  %1851 = vrcp.f32 %v880_v29  ;;  %v865_v24 = vadd.f32 %v2369_v46, %v725_v4  ;;  %v2627_v36 = vmin.f32 %v733_v7, %v2369_v46  ;;  %1244 = vperm.xlu0 %1810, %v2203_v6  }
  0xdf   : > { %v867_v37 = vadd.f32 %v2369_v46, %v733_v7  ;;  %vm613_vm14 = vcmp.eq.f32.partialorder %v2496_v55, inf  ;;  %v2632_v0 = vpop.eup %1831  ;;  %1853 = vlog2.f32 %v815_v47  ;;  %v801_v54 = vmul.f32 %v2623_v13, %v575_v3 }
  0xe0   : > { %v2643_v57 = vsel %vm601_vm13, %v602_v1, %v600_v40  ;;  %v672_v39 = vmax.f32 %v2620_v62, 1e-08  ;;  %v2646_v48 = vpop.eup %1833  ;;  %1855 = vlog2.f32 %v816_v42  ;;  %v881_v6 = vmax.f32 %v865_v24, 1e-08  ;;  %1192 = vperm.xlu1 %1808, %v2235_v14   ;;  %v729_v41 = vpop.permute.xlu1 %728 }
  0xe1   : > { %v803_v50 = vmul.f32 %v2627_v36, %v589_v60  ;;  %v883_v32 = vmax.f32 %v867_v37, 1e-08  ;;  %v741_v28 = vpop.permute.xlu0 %740  ;;  %v817_v3 = vmax.f32 %v801_v54, 1e-08  ;;  %1857 = vlog2.f32 %v671_v5  ;;  %v1836_v1 = vpop.eup %1835 }
  0xe2   : > { %v2651_v53 = vmin.f32 %v729_v41, %v2369_v46  ;;  %v866_v2 = vadd.f32 %v2369_v46, %v729_v41  ;;  %vm615_vm15 = vcmp.eq.f32.partialorder %v2496_v55, 0.0  ;;  %1859 = vrcp.f32 %v881_v6  ;;  %1252 = vperm.xlu0 %1810, %v2211_v8   ;;  %v2003_v41 = vld [vmem:[%s2181_s27] sm:$0xff] }
  0xe3   : > { %v819_v15 = vmax.f32 %v803_v50, 1e-08  ;;  %v673_v49 = vmax.f32 %v2643_v57, 1e-08  ;;  %v2657_v27 = vmin.f32 %v741_v28, %v2369_v46  ;;  %v2660_v14 = vpop.eup %1837  ;;  %v684_v44 = vmul.f32 0.6931472, %v1836_v1 }
  0xe4   : > { %1861 = vlog2.f32 %v817_v3  ;;  %v802_v58 = vmul.f32 %v2651_v53, %v2568_v31  ;;  %v882_v60 = vmax.f32 %v866_v2, 1e-08  ;;  %vm606_vm0 = vcmp.eq.f32.partialorder %v2484_v43, inf  ;;  %v2665_v23 = vpop.eup %1839  ;;  %1200 = vperm.xlu1 %1808, %v2243_v16   ;;  %v737_v8 = vpop.permute.xlu1 %736 }
  0xe5   : > { %1863 = vlog2.f32 %v819_v15  ;;  %v805_v59 = vmul.f32 %v2657_v27, %v2643_v57  ;;  %v869_v5 = vadd.f32 %v2369_v46, %v741_v28  ;;  %v612_v51 = vmul.f32 %v1828_v22, %v2496_v55  ;;  %v749_v52 = vpop.permute.xlu0 %748  ;;  %v1842_v20 = vpop.eup %1841  ;;  %1694 = vst [vmem:[%s2673_s6 + $0x100] sm:$0xff] %v684_v44 }
  0xe6   : > { %1865 = vrcp.f32 %v883_v32  ;;  %v818_v26 = vmax.f32 %v802_v58, 1e-08  ;;  %v2677_v25 = vmin.f32 %v737_v8, %v2369_v46  ;;  %v868_v29 = vadd.f32 %v2369_v46, %v737_v8  ;;  %1260 = vperm.xlu0 %1810, %v2219_v10  }
  0xe7   : > { %vm608_vm1 = vcmp.eq.f32.partialorder %v2484_v43, 0.0  ;;  %v686_v16 = vmul.f32 0.6931472, %v1842_v20  ;;  %1867 = vlog2.f32 %v670_v30  ;;  %v821_v22 = vmax.f32 %v805_v59, 1e-08  ;;  %v2684_v7 = vpop.eup %1843 }
  0xe8   : > { %v885_v4 = vmax.f32 %v869_v5, 1e-08  ;;  %1869 = vlog2.f32 %v818_v26  ;;  %v804_v40 = vmul.f32 %v2677_v25, %v2620_v62  ;;  %v884_v47 = vmax.f32 %v868_v29, 1e-08  ;;  %v2691_v24 = vpop.eup %1845  ;;  %1809 = vset.pattern.permute.xlu1 %v2099_v33  ;;  %v745_v37 = vpop.permute.xlu1 %744  ;;  %v2004_v62 = vld [vmem:[%s2181_s27 + $0x10] sm:$0xff]  ;;  %v2005_v26 = vld [vmem:[%s2181_s27 + $0x60] sm:$0xff] }
  0xe9   : > { %v614_v42 = vsel %vm613_vm14, %v2496_v55, %v612_v51  ;;  %1695 = vst [vmem:[%s2673_s6 + $0x108] sm:$0xff] %v686_v16  ;;  %1871 = vrcp.f32 %v882_v60  ;;  %v616_v31 = vand.u32 2147483648, %v2496_v55  ;;  %v2696_v10 = vmin.f32 %v749_v52, %v2369_v46  ;;  %v2702_v54 = vpop.permute.xlu0 %756  ;;  %v1848_v57 = vpop.eup %1847  ;;  %1228 = vperm.xlu1 %1809, %v2003_v41  }
  0xea   : > { %v2699_v30 = vadd.f32 %v2369_v46, %v749_v52  ;;  %1873 = vlog2.f32 %v673_v49  ;;  %v820_v6 = vmax.f32 %v804_v40, 1e-08  ;;  %v605_v50 = vmul.f32 %v2598_v11, %v2484_v43  ;;  %v1850_v28 = vpop.eup %1849  ;;  %1268 = vperm.xlu0 %1810, %v2227_v12  }
  0xeb   : > { %v2707_v32 = vmin.f32 %v745_v37, %v2369_v46  ;;  %v688_v3 = vmul.f32 0.6931472, %v1848_v57  ;;  %1875 = vlog2.f32 %v821_v22  ;;  %v617_v33 = vsel %vm615_vm15, %v616_v31, %v614_v42  ;;  %v1852_v1 = vpop.eup %1851 }
  0xec   : > { %v887_v2 = vmax.f32 %v2699_v30, 1e-08  ;;  %v911_v15 = vmul.f32 %v1850_v28, %v2590_v19  ;;  %1877 = vrcp.f32 %v885_v4  ;;  %v675_v11 = vmax.f32 %v617_v33, 1e-08  ;;  %v1854_v44 = vpop.eup %1853  ;;  %v2726_v19 = vpop.permute.xlu1 %752  ;;  %v2007_v28 = vld [vmem:[%s2181_s27 + $0x70] sm:$0xff] }
  0xed   : > { %v807_v49 = vmul.f32 %v2696_v10, %v617_v33  ;;  %v912_v58 = vmul.f32 %v1852_v1, %v2595_v34  ;;  %1696 = vst [vmem:[%s2673_s6 + $0x110] sm:$0xff] %v688_v3  ;;  %1879 = vlog2.f32 %v672_v39  ;;  %v607_v55 = vsel %vm606_vm0, %v2484_v43, %v605_v50  ;;  %v2728_v60 = vpop.permute.xlu0 %764  ;;  %v1856_v59 = vpop.eup %1855  ;;  %1236 = vperm.xlu1 %1809, %v2004_v62  }
  0xee   : > { %v2724_v12 = vadd.f32 %v2369_v46, %v745_v37  ;;  %v832_v5 = vmul.f32 0.6931472, %v1854_v44  ;;  %v927_v34 = vmax.f32 %v911_v15, 1e-08  ;;  %1881 = vlog2.f32 %v820_v6  ;;  %v1858_v39 = vpop.eup %1857  ;;  %1276 = vperm.xlu0 %1810, %v2005_v26   ;;  %v2006_v6 = vld [vmem:[%s2181_s27 + $0x18] sm:$0xff] }
  0xef   : > { %v823_v8 = vmax.f32 %v807_v49, 1e-08  ;;  %v834_v51 = vmul.f32 0.6931472, %v1856_v59  ;;  %v928_v52 = vmax.f32 %v912_v58, 1e-08  ;;  %1883 = vrcp.f32 %v884_v47  ;;  %v1860_v29 = vpop.eup %1859 }
  0xf0   : > { %v610_v20 = vsel %vm608_vm1, %v609_v61, %v607_v55  ;;  %1885 = vlog2.f32 %v927_v34  ;;  %1471 = vst [vmem:[%s2673_s6] sm:$0xff] %v832_v5  ;;  %v692_v16 = vmul.f32 0.6931472, %v1858_v39  ;;  %v913_v47 = vmul.f32 %v1860_v29, %v2623_v13  ;;  %v2743_v61 = vpop.permute.xlu1 %760 }
  0xf1   : > { %v674_v22 = vmax.f32 %v610_v20, 1e-08  ;;  %v806_v4 = vmul.f32 %v2707_v32, %v610_v20  ;;  %v1862_v40 = vpop.eup %1861  ;;  %1887 = vlog2.f32 %v928_v52  ;;  %1472 = vst [vmem:[%s2673_s6 + $0x8] sm:$0xff] %v834_v51  ;;  %v886_v42 = vmax.f32 %v2724_v12, 1e-08  ;;  %v2745_v31 = vpop.permute.xlu0 %772  ;;  %1240 = vperm.xlu1 %1809, %v2006_v6   ;;  %v2008_v12 = vld [vmem:[%s2181_s27 + $0x28] sm:$0xff] }
  0xf2   : > { %v626_v43 = vmul.f32 %v2632_v0, %v2523_v63  ;;  %v1864_v30 = vpop.eup %1863  ;;  %v836_v37 = vmul.f32 0.6931472, %v1862_v40  ;;  %1698 = vst [vmem:[%s2673_s6 + $0x120] sm:$0xff] %v692_v16  ;;  %1889 = vlog2.f32 %v675_v11  ;;  %vm627_vm2 = vcmp.eq.f32.partialorder %v2523_v63, inf  ;;  %1284 = vperm.xlu0 %1810, %v2007_v28   ;;  %v2009_v40 = vld [vmem:[%s2181_s27 + $0x38] sm:$0xff] }
  0xf3   : > { %v822_v57 = vmax.f32 %v806_v4, 1e-08  ;;  %v1866_v13 = vpop.eup %1865  ;;  %v929_v50 = vmax.f32 %v913_v47, 1e-08  ;;  %v840_v41 = vmul.f32 0.6931472, %v1864_v30  ;;  %1891 = vlog2.f32 %v823_v8 }
  0xf4   : > { %v628_v0 = vsel %vm627_vm2, %v2523_v63, %v626_v43  ;;  %v1868_v3 = vpop.eup %1867  ;;  %1473 = vst [vmem:[%s2673_s6 + $0x10] sm:$0xff] %v836_v37  ;;  %v915_v33 = vmul.f32 %v1866_v13, %v2627_v36  ;;  %1893 = vrcp.f32 %v887_v2  ;;  %vm629_vm3 = vcmp.eq.f32.partialorder %v2523_v63, 0.0  ;;  %v2763_v58 = vpop.permute.xlu1 %768 }
  0xf5   : > { %v630_v1 = vand.u32 2147483648, %v2523_v63  ;;  %v1870_v15 = vpop.eup %1869  ;;  %1895 = vlog2.f32 %v929_v50  ;;  %1475 = vst [vmem:[%s2673_s6 + $0x20] sm:$0xff] %v840_v41  ;;  %v690_v11 = vmul.f32 0.6931472, %v1868_v3  ;;  %v2759_v49 = vmin.f32 %v2702_v54, %v2369_v46  ;;  %1248 = vperm.xlu1 %1809, %v2008_v12   ;;  %v2766_v59 = vpop.permute.xlu0 %976 }
  0xf6   : > { %v873_v44 = vadd.f32 %v2369_v46, %v2702_v54  ;;  %v1872_v36 = vpop.eup %1871  ;;  %v931_v2 = vmax.f32 %v915_v33, 1e-08  ;;  %v838_v55 = vmul.f32 0.6931472, %v1870_v15  ;;  %1897 = vlog2.f32 %v674_v22  ;;  %v2010_v15 = vld [vmem:[%s2181_s27 + $0x48] sm:$0xff] }
  0xf7   : > { %v631_v63 = vsel %vm629_vm3, %v630_v1, %v628_v0  ;;  %v1874_v5 = vpop.eup %1873  ;;  %v914_v34 = vmul.f32 %v1872_v36, %v2651_v53  ;;  %1697 = vst [vmem:[%s2673_s6 + $0x118] sm:$0xff] %v690_v11  ;;  %1899 = vlog2.f32 %v822_v57  ;;  %v619_v52 = vmul.f32 %v2609_v35, %v2498_v56 }
  0xf8   : > { %v677_v8 = vmax.f32 %v631_v63, 1e-08  ;;  %v809_v54 = vmul.f32 %v2759_v49, %v631_v63  ;;  %v1876_v62 = vpop.eup %1875  ;;  %1901 = vlog2.f32 %v931_v2  ;;  %1474 = vst [vmem:[%s2673_s6 + $0x18] sm:$0xff] %v838_v55  ;;  %v696_v39 = vmul.f32 0.6931472, %v1874_v5  ;;  %v2774_v16 = vpop.permute.xlu1 %776 }
  0xf9   : > { %v889_v51 = vmax.f32 %v873_v44, 1e-08  ;;  %v1878_v20 = vpop.eup %1877  ;;  %v930_v26 = vmax.f32 %v914_v34, 1e-08  ;;  %v844_v29 = vmul.f32 0.6931472, %v1876_v62  ;;  %1903 = vrcp.f32 %v886_v42  ;;  %1256 = vperm.xlu1 %1809, %v2009_v40   ;;  %v2781_v35 = vpop.permute.xlu0 %988 }
  0xfa   : > { %v825_v53 = vmax.f32 %v809_v54, 1e-08  ;;  %v1880_v22 = vpop.eup %1879  ;;  %v917_v4 = vmul.f32 %v1878_v20, %v2657_v27  ;;  %1700 = vst [vmem:[%s2673_s6 + $0x130] sm:$0xff] %v696_v39  ;;  %1905 = vlog2.f32 %v677_v8  ;;  %vm620_vm4 = vcmp.eq.f32.partialorder %v2498_v56, inf }
  0xfb   : > { %vm622_vm5 = vcmp.eq.f32.partialorder %v2498_v56, 0.0  ;;  %v1882_v47 = vpop.eup %1881  ;;  %1907 = vlog2.f32 %v930_v26  ;;  %1477 = vst [vmem:[%s2673_s6 + $0x30] sm:$0xff] %v844_v29  ;;  %v694_v42 = vmul.f32 0.6931472, %v1880_v22  ;;  %v621_v43 = vsel %vm620_vm4, %v2498_v56, %v619_v52 }
  0xfc   : > { %v623_v27 = vand.u32 2147483648, %v2498_v56  ;;  %v1884_v30 = vpop.eup %1883  ;;  %v933_v37 = vmax.f32 %v917_v4, 1e-08  ;;  %v842_v57 = vmul.f32 0.6931472, %v1882_v47  ;;  %1909 = vlog2.f32 %v825_v53 }
  0xfd   : > { %v2788_v6 = vmin.f32 %v2726_v19, %v2369_v46  ;;  %v1886_v13 = vpop.eup %1885  ;;  %v916_v50 = vmul.f32 %v1884_v30, %v2677_v25  ;;  %1699 = vst [vmem:[%s2673_s6 + $0x128] sm:$0xff] %v694_v42  ;;  %1911 = vrcp.f32 %v889_v51  ;;  %v872_v0 = vadd.f32 %v2369_v46, %v2726_v19  ;;  %1264 = vperm.xlu1 %1809, %v2010_v15   ;;  %v2799_v25 = vpop.permute.xlu1 %980  ;;  %v2011_v51 = vld [vmem:[%s2181_s27 + $0x58] sm:$0xff] }
  0xfe   : > { %v624_v41 = vsel %vm622_vm5, %v623_v27, %v621_v43  ;;  %v1888_v28 = vpop.eup %1887  ;;  %v944_v3 = vmul.f32 0.6931472, %v1886_v13  ;;  %1913 = vlog2.f32 %v933_v37  ;;  %1476 = vst [vmem:[%s2673_s6 + $0x28] sm:$0xff] %v842_v57  ;;  %v2801_v11 = vpop.permute.xlu0 %996  ;;  %v640_v19 = vmul.f32 %v2660_v14, %v2550_v45 }
  0xff   : > { %v676_v33 = vmax.f32 %v624_v41, 1e-08  ;;  %v808_v1 = vmul.f32 %v2788_v6, %v624_v41  ;;  %v1890_v56 = vpop.eup %1889  ;;  %v946_v44 = vmul.f32 0.6931472, %v1888_v28  ;;  %v932_v36 = vmax.f32 %v916_v50, 1e-08 }
 0x100   : > { %v888_v2 = vmax.f32 %v872_v0, 1e-08  ;;  %v1892_v55 = vpop.eup %1891  ;;  %1678 = vst [vmem:[%s2673_s6 + $0x80] sm:$0xff] %v944_v3  ;;  %v700_v63 = vmul.f32 0.6931472, %v1890_v56  ;;  %vm641_vm6 = vcmp.eq.f32.partialorder %v2550_v45, inf  ;;  %v2815_v39 = vmin.f32 %v2728_v60, %v2369_v46 }
 0x101   : > { %1915 = vlog2.f32 %v676_v33  ;;  %v824_v12 = vmax.f32 %v808_v1, 1e-08  ;;  %v1894_v5 = vpop.eup %1893  ;;  %1679 = vst [vmem:[%s2673_s6 + $0x88] sm:$0xff] %v946_v44  ;;  %v848_v34 = vmul.f32 0.6931472, %v1892_v55  ;;  %v642_v8 = vsel %vm641_vm6, %v2550_v45, %v640_v19  ;;  %1272 = vperm.xlu1 %1809, %v2011_v51   ;;  %v2818_v52 = vpop.permute.xlu1 %984 }
 0x102   : > { %1917 = vlog2.f32 %v932_v36  ;;  %vm643_vm7 = vcmp.eq.f32.partialorder %v2550_v45, 0.0  ;;  %v1896_v54 = vpop.eup %1895  ;;  %v919_v14 = vmul.f32 %v1894_v5, %v2696_v10  ;;  %1702 = vst [vmem:[%s2673_s6 + $0x140] sm:$0xff] %v700_v63  ;;  %v644_v62 = vand.u32 2147483648, %v2550_v45  ;;  %v2820_v20 = vpop.permute.xlu0 %1004  ;;  %v2012_v45 = vld [vmem:[%s2181_s27 + $0x68] sm:$0xff] }
 0x103   : > { %1919 = vlog2.f32 %v824_v12  ;;  %v1898_v26 = vpop.eup %1897  ;;  %v948_v29 = vmul.f32 0.6931472, %v1896_v54  ;;  %1479 = vst [vmem:[%s2673_s6 + $0x40] sm:$0xff] %v848_v34  ;;  %v875_v10 = vadd.f32 %v2369_v46, %v2728_v60  ;;  %v633_v53 = vmul.f32 %v2646_v48, %v2526_v18  ;;  %v2013_v34 = vld [vmem:[%s2181_s27 + $0x78] sm:$0xff] }
 0x104   : > { %1921 = vrcp.f32 %v888_v2  ;;  %v1900_v22 = vpop.eup %1899  ;;  %v935_v4 = vmax.f32 %v919_v14, 1e-08  ;;  %v698_v40 = vmul.f32 0.6931472, %v1898_v26  ;;  %v645_v47 = vsel %vm643_vm7, %v644_v62, %v642_v8 }
 0x105   : > { %vm634_vm8 = vcmp.eq.f32.partialorder %v2526_v18, inf  ;;  %v1902_v42 = vpop.eup %1901  ;;  %1680 = vst [vmem:[%s2673_s6 + $0x90] sm:$0xff] %v948_v29  ;;  %v846_v43 = vmul.f32 0.6931472, %v1900_v22  ;;  %v679_v27 = vmax.f32 %v645_v47, 1e-08  ;;  %v811_v60 = vmul.f32 %v2815_v39, %v645_v47  ;;  %1280 = vperm.xlu1 %1809, %v2012_v45   ;;  %v2836_v13 = vpop.permute.xlu1 %992 }
 0x106   : > { %v891_v30 = vmax.f32 %v875_v10, 1e-08  ;;  %v1904_v37 = vpop.eup %1903  ;;  %v952_v57 = vmul.f32 0.6931472, %v1902_v42  ;;  %1923 = vlog2.f32 %v935_v4  ;;  %1701 = vst [vmem:[%s2673_s6 + $0x138] sm:$0xff] %v698_v40  ;;  %v635_v48 = vsel %vm634_vm8, %v2526_v18, %v633_v53  ;;  %v2838_v50 = vpop.permute.xlu0 %1012 }
 0x107   : > { %vm636_vm9 = vcmp.eq.f32.partialorder %v2526_v18, 0.0  ;;  %v1906_v41 = vpop.eup %1905  ;;  %v918_v0 = vmul.f32 %v1904_v37, %v2707_v32  ;;  %1478 = vst [vmem:[%s2673_s6 + $0x38] sm:$0xff] %v846_v43  ;;  %1925 = vlog2.f32 %v679_v27  ;;  %v827_v28 = vmax.f32 %v811_v60, 1e-08 }
 0x108   : > { %v637_v3 = vand.u32 2147483648, %v2526_v18  ;;  %v1908_v33 = vpop.eup %1907  ;;  %1682 = vst [vmem:[%s2673_s6 + $0xa0] sm:$0xff] %v952_v57  ;;  %v704_v1 = vmul.f32 0.6931472, %v1906_v41  ;;  %1927 = vrcp.f32 %v891_v30  ;;  %v2846_v15 = vmin.f32 %v2743_v61, %v2369_v46 }
 0x109   : > { %v874_v56 = vadd.f32 %v2369_v46, %v2743_v61  ;;  %v1910_v44 = vpop.eup %1909  ;;  %v950_v32 = vmul.f32 0.6931472, %v1908_v33  ;;  %v934_v36 = vmax.f32 %v918_v0, 1e-08  ;;  %1929 = vlog2.f32 %v827_v28  ;;  %1288 = vperm.xlu1 %1809, %v2013_v34   ;;  %v2855_v8 = vpop.permute.xlu1 %1000 }
 0x10a   : > { %v638_v2 = vsel %vm636_vm9, %v637_v3, %v635_v48  ;;  %v1912_v19 = vpop.eup %1911  ;;  %v852_v55 = vmul.f32 0.6931472, %v1910_v44  ;;  %1704 = vst [vmem:[%s2673_s6 + $0x150] sm:$0xff] %v704_v1  ;;  %v2857_v61 = vpop.permute.xlu0 %1020  ;;  %v654_v14 = vmul.f32 %v2684_v7, %v2579_v9  ;;  %vm655_vm10 = vcmp.eq.f32.partialorder %v2579_v9, inf }
 0x10b   : > { %v678_v63 = vmax.f32 %v638_v2, 1e-08  ;;  %v810_v12 = vmul.f32 %v2846_v15, %v638_v2  ;;  %v890_v5 = vmax.f32 %v874_v56, 1e-08  ;;  %v1914_v54 = vpop.eup %1913  ;;  %1681 = vst [vmem:[%s2673_s6 + $0x98] sm:$0xff] %v950_v32  ;;  %1931 = vlog2.f32 %v934_v36 }
 0x10c   : > { %v921_v18 = vmul.f32 %v1912_v19, %v2759_v49  ;;  %v956_v62 = vmul.f32 0.6931472, %v1914_v54  ;;  %1481 = vst [vmem:[%s2673_s6 + $0x50] sm:$0xff] %v852_v55  ;;  %vm657_vm11 = vcmp.eq.f32.partialorder %v2579_v9, 0.0  ;;  %v656_v10 = vsel %vm655_vm10, %v2579_v9, %v654_v14 }
 0x10d   : > { %1933 = vlog2.f32 %v678_v63  ;;  %v826_v51 = vmax.f32 %v810_v12, 1e-08  ;;  %v658_v53 = vand.u32 2147483648, %v2579_v9  ;;  %v2871_v7 = vmin.f32 %v2745_v31, %v2369_v46  ;;  %v2875_v40 = vpop.permute.xlu1 %1008 }
 0x10e   : > { %v1916_v26 = vpop.eup %1915  ;;  %v937_v29 = vmax.f32 %v921_v18, 1e-08  ;;  %1935 = vrcp.f32 %v890_v5  ;;  %1684 = vst [vmem:[%s2673_s6 + $0xb0] sm:$0xff] %v956_v62  ;;  %v877_v4 = vadd.f32 %v2369_v46, %v2745_v31  ;;  %v2877_v47 = vpop.permute.xlu0 %1028  ;;  %v647_v60 = vmul.f32 %v2665_v23, %v2553_v17 }
 0x10f   : > { %v1918_v49 = vpop.eup %1917  ;;  %v702_v22 = vmul.f32 0.6931472, %v1916_v26  ;;  %1937 = vlog2.f32 %v826_v51  ;;  %v659_v27 = vsel %vm657_vm11, %v658_v53, %v656_v10  ;;  %vm648_vm12 = vcmp.eq.f32.partialorder %v2553_v17, inf }
 0x110   : > { %v1920_v42 = vpop.eup %1919  ;;  %v954_v43 = vmul.f32 0.6931472, %v1918_v49  ;;  %1939 = vlog2.f32 %v937_v29  ;;  %v681_v57 = vmax.f32 %v659_v27, 1e-08  ;;  %v813_v31 = vmul.f32 %v2871_v7, %v659_v27 }
 0x111   : > { %v1922_v30 = vpop.eup %1921  ;;  %v850_v37 = vmul.f32 0.6931472, %v1920_v42  ;;  %1703 = vst [vmem:[%s2673_s6 + $0x148] sm:$0xff] %v702_v22  ;;  %v893_v48 = vmax.f32 %v877_v4, 1e-08  ;;  %vm650_vm13 = vcmp.eq.f32.partialorder %v2553_v17, 0.0  ;;  %v649_v23 = vsel %vm648_vm12, %v2553_v17, %v647_v60  ;;  %v2896_v28 = vpop.permute.xlu1 %1016 }
 0x112   : > { %1683 = vst [vmem:[%s2673_s6 + $0xa8] sm:$0xff] %v954_v43  ;;  %v920_v45 = vmul.f32 %v1922_v30, %v2788_v6  ;;  %v651_v9 = vand.u32 2147483648, %v2553_v17  ;;  %1941 = vlog2.f32 %v681_v57  ;;  %v829_v41 = vmax.f32 %v813_v31, 1e-08  ;;  %v2898_v3 = vpop.permute.xlu0 %1036 }
 0x113   : > { %1480 = vst [vmem:[%s2673_s6 + $0x48] sm:$0xff] %v850_v37  ;;  %v2894_v0 = vmin.f32 %v2763_v58, %v2369_v46  ;;  %3226 = vst [vmem:[#allocation5_spill] sm:$0xff] %v2898_v3  ;;  %v1924_v6 = vpop.eup %1923  ;;  %1943 = vrcp.f32 %v893_v48  ;;  %v876_v56 = vadd.f32 %v2369_v46, %v2763_v58  ;;  %v661_v58 = vmul.f32 %v2691_v24, %v2582_v38 }
 0x114   : > { %v936_v33 = vmax.f32 %v920_v45, 1e-08  ;;  %v652_v1 = vsel %vm650_vm13, %v651_v9, %v649_v23  ;;  %v1926_v44 = vpop.eup %1925  ;;  %v960_v32 = vmul.f32 0.6931472, %v1924_v6  ;;  %1945 = vlog2.f32 %v829_v41 }
 0x115   : > { %v680_v17 = vmax.f32 %v652_v1, 1e-08  ;;  %v812_v36 = vmul.f32 %v2894_v0, %v652_v1  ;;  %v1928_v2 = vpop.eup %1927  ;;  %v708_v19 = vmul.f32 0.6931472, %v1926_v44  ;;  %v892_v55 = vmax.f32 %v876_v56, 1e-08  ;;  %v2907_v34 = vpop.permute.xlu1 %1024 }
 0x116   : > { %1947 = vlog2.f32 %v936_v33  ;;  %v1930_v63 = vpop.eup %1929  ;;  %1686 = vst [vmem:[%s2673_s6 + $0xc0] sm:$0xff] %v960_v32  ;;  %v923_v12 = vmul.f32 %v1928_v2, %v2815_v39  ;;  %vm662_vm14 = vcmp.eq.f32.partialorder %v2582_v38, inf  ;;  %v2911_v18 = vpop.permute.xlu0 %1064  ;;  %v665_v24 = vand.u32 2147483648, %v2582_v38 }
 0x117   : > { %1949 = vlog2.f32 %v680_v17  ;;  %v828_v5 = vmax.f32 %v812_v36, 1e-08  ;;  %v856_v54 = vmul.f32 0.6931472, %v1930_v63  ;;  %1706 = vst [vmem:[%s2673_s6 + $0x160] sm:$0xff] %v708_v19  ;;  %v663_v39 = vsel %vm662_vm14, %v2582_v38, %v661_v58 }
 0x118   : > { %1951 = vrcp.f32 %v892_v55  ;;  %v1932_v14 = vpop.eup %1931  ;;  %v939_v62 = vmax.f32 %v923_v12, 1e-08  ;;  %v2918_v29 = vmin.f32 %v2774_v16, %v2369_v46  ;;  %vm664_vm15 = vcmp.eq.f32.partialorder %v2582_v38, 0.0 }
 0x119   : > { %1953 = vlog2.f32 %v828_v5  ;;  %v958_v26 = vmul.f32 0.6931472, %v1932_v14  ;;  %1483 = vst [vmem:[%s2673_s6 + $0x60] sm:$0xff] %v856_v54  ;;  %v878_v49 = vadd.f32 %v2369_v46, %v2774_v16  ;;  %v2923_v22 = vpop.permute.xlu1 %1032  ;;  %v666_v43 = vsel %vm664_vm15, %v665_v24, %v663_v39 }
 0x11a   : > { %v1934_v51 = vpop.eup %1933  ;;  %1955 = vlog2.f32 %v939_v62  ;;  %v2927_v27 = vpop.permute.xlu0 %1076  ;;  %v682_v37 = vmax.f32 %v666_v43, 1e-08  ;;  %v814_v38 = vmul.f32 %v2918_v29, %v666_v43 }
 0x11b   : > { %v1936_v10 = vpop.eup %1935  ;;  %v706_v53 = vmul.f32 0.6931472, %v1934_v51  ;;  %1685 = vst [vmem:[%s2673_s6 + $0xb8] sm:$0xff] %v958_v26  ;;  %v894_v48 = vmax.f32 %v878_v49, 1e-08 }
 0x11c   : > { %v1938_v4 = vpop.eup %1937  ;;  %v922_v42 = vmul.f32 %v1936_v10, %v2846_v15  ;;  %1957 = vlog2.f32 %v682_v37  ;;  %v830_v46 = vmax.f32 %v814_v38, 1e-08 }
 0x11d   : > { %v1940_v60 = vpop.eup %1939  ;;  %v854_v30 = vmul.f32 0.6931472, %v1938_v4  ;;  %1705 = vst [vmem:[%s2673_s6 + $0x158] sm:$0xff] %v706_v53 }
 0x11e   : > { %v964_v57 = vmul.f32 0.6931472, %v1940_v60  ;;  %v938_v31 = vmax.f32 %v922_v42, 1e-08  ;;  %v2933_v15 = vpop.permute.xlu1 %1060  ;;  %v2935_v45 = vpop.permute.xlu0 %1084 }
 0x11f   : > { %1482 = vst [vmem:[%s2673_s6 + $0x58] sm:$0xff] %v854_v30  ;;  %v1942_v16 = vpop.eup %1941 }
 0x120   : > { %1688 = vst [vmem:[%s2673_s6 + $0xd0] sm:$0xff] %v964_v57  ;;  %1959 = vlog2.f32 %v938_v31  ;;  %v1944_v9 = vpop.eup %1943  ;;  %v712_v41 = vmul.f32 0.6931472, %v1942_v16 }
 0x121   : > { %1961 = vlog2.f32 %v830_v46  ;;  %v1946_v23 = vpop.eup %1945  ;;  %v925_v6 = vmul.f32 %v1944_v9, %v2871_v7 }
 0x122   : > { %1963 = vrcp.f32 %v894_v48  ;;  %v860_v1 = vmul.f32 0.6931472, %v1946_v23  ;;  %1708 = vst [vmem:[%s2673_s6 + $0x170] sm:$0xff] %v712_v41  ;;  %v2939_v17 = vpop.permute.xlu1 %1068  ;;  %v2941_v36 = vpop.permute.xlu0 %1092 }
 0x123   : > { %v1948_v33 = vpop.eup %1947  ;;  %v941_v32 = vmax.f32 %v925_v6, 1e-08 }
 0x124   : > { %v1950_v56 = vpop.eup %1949  ;;  %v962_v44 = vmul.f32 0.6931472, %v1948_v33  ;;  %1485 = vst [vmem:[%s2673_s6 + $0x70] sm:$0xff] %v860_v1 }
 0x125   : > { %v1952_v2 = vpop.eup %1951  ;;  %v710_v19 = vmul.f32 0.6931472, %v1950_v56  ;;  %1965 = vlog2.f32 %v941_v32  ;;  %v1041_v32 = vsub.s32 3, %v2288_v21 }
 0x126   : > { %v1954_v55 = vpop.eup %1953  ;;  %1687 = vst [vmem:[%s2673_s6 + $0xc8] sm:$0xff] %v962_v44  ;;  %v924_v7 = vmul.f32 %v1952_v2, %v2894_v0  ;;  %v2947_v58 = vpop.permute.xlu1 %1072 }
 0x127   : > { %v858_v63 = vmul.f32 0.6931472, %v1954_v55  ;;  %1707 = vst [vmem:[%s2673_s6 + $0x168] sm:$0xff] %v710_v19  ;;  %v1956_v12 = vpop.eup %1955  ;;  %v2949_v54 = vpop.permute.xlu0 %1100  ;;  %v1209_v19 = vsub.s32 1, %v2288_v21 }
 0x128   : > { %v940_v5 = vmax.f32 %v924_v7, 1e-08  ;;  %v968_v14 = vmul.f32 0.6931472, %v1956_v12  ;;  %v2014_v7 = vld [vmem:[%s2293_s3] sm:$0x7f] }
 0x129   : > { %1484 = vst [vmem:[%s2673_s6 + $0x68] sm:$0xff] %v858_v63  ;;  %v1958_v62 = vpop.eup %1957  ;;  %v2993_v63 = vrot.slane %v2014_v7, %v1041_v32  ;;  %v1125_v12 = vsub.s32 0, %v2288_v21 }
 0x12a   : > { %1967 = vlog2.f32 %v940_v5  ;;  %1690 = vst [vmem:[%s2673_s6 + $0xe0] sm:$0xff] %v968_v14  ;;  %v2953_v39 = vpop.permute.xlu1 %1080  ;;  %v714_v26 = vmul.f32 0.6931472, %v1958_v62  ;;  %v2998_v14 = vrot.slane %v2014_v7, %v1209_v19  ;;  %v1293_v62 = vsub.s32 2, %v2288_v21 }
 0x12b   : > { %v2955_v51 = vpop.permute.xlu0 %1108  ;;  %v1045_v21 = vadd.f32 %v2993_v63, %v2818_v52  ;;  %v1051_v52 = vadd.f32 %v2993_v63, %v2875_v40  ;;  %v1053_v32 = vadd.f32 %v2993_v63, %v2896_v28 }
 0x12c   : > { %1709 = vst [vmem:[%s2673_s6 + $0x178] sm:$0xff] %v714_v26  ;;  %v1046_v26 = vadd.f32 %v2993_v63, %v2781_v35 }
 0x12d   : > { %v1960_v0 = vpop.eup %1959 }
 0x12e   : > { %v1962_v24 = vpop.eup %1961  ;;  %v966_v10 = vmul.f32 0.6931472, %v1960_v0  ;;  %v2960_v42 = vpop.permute.xlu1 %1088  ;;  %v1043_v0 = vadd.f32 %v2993_v63, %v2766_v59  ;;  %v1047_v59 = vadd.f32 %v2993_v63, %v2836_v13 }
 0x12f   : > { %v1964_v53 = vpop.eup %1963  ;;  %v862_v49 = vmul.f32 0.6931472, %v1962_v24  ;;  %v2962_v43 = vpop.permute.xlu0 %1116 }
 0x130   : > { %1689 = vst [vmem:[%s2673_s6 + $0xd8] sm:$0xff] %v966_v10  ;;  %v926_v4 = vmul.f32 %v1964_v53, %v2918_v29  ;;  %v1044_v10 = vadd.f32 %v2993_v63, %v2799_v25  ;;  %v3007_v53 = vrot.slane %v2014_v7, %v1125_v12  ;;  %v3022_v25 = vmul.f32 %v1043_v0, %v1043_v0 }
 0x131   : > { %1486 = vst [vmem:[%s2673_s6 + $0x78] sm:$0xff] %v862_v49 }
 0x132   : > { %v942_v60 = vmax.f32 %v926_v4, 1e-08  ;;  %v1966_v30 = vpop.eup %1965  ;;  %v2965_v38 = vpop.permute.xlu1 %1096  ;;  %v1128_v35 = vadd.f32 %v3007_v53, %v2911_v18  ;;  %v3033_v18 = vmul.f32 %v1045_v21, %v1045_v21  ;;  %v1131_v12 = vadd.f32 %v3007_v53, %v2927_v27 }
 0x133   : > { %v972_v37 = vmul.f32 0.6931472, %v1966_v30  ;;  %v2967_v57 = vpop.permute.xlu0 %1144  ;;  %v3020_v30 = vrot.slane %v2014_v7, %v1293_v62  ;;  %v1127_v0 = vadd.f32 %v3007_v53, %v2933_v15  ;;  %v3051_v21 = vmul.f32 %v1053_v32, %v1053_v32 }
 0x134   : > { %1969 = vlog2.f32 %v942_v60  ;;  %v1048_v60 = vadd.f32 %v2993_v63, %v2801_v11  ;;  %v1312_v11 = vmul.f32 %v1044_v10, %v1044_v10  ;;  %v1328_v7 = vmul.f32 %v1128_v35, %v1128_v35 }
 0x135   : > { %1692 = vst [vmem:[%s2673_s6 + $0xf0] sm:$0xff] %v972_v37  ;;  %v3024_v37 = vmul.f32 %v1046_v26, %v1046_v26  ;;  %v3049_v10 = vmul.f32 %v1051_v52, %v1051_v52  ;;  %v1133_v27 = vadd.f32 %v3007_v53, %v2935_v45  ;;  %v1130_v32 = vadd.f32 %v3007_v53, %v2947_v58 }
 0x136   : > { %v2970_v46 = vpop.permute.xlu1 %1104 }
 0x137   : > { %v1968_v31 = vpop.eup %1967  ;;  %v2972_v29 = vpop.permute.xlu0 %1156  ;;  %v1333_v3 = vmul.f32 %v1133_v27, %v1133_v27 }
 0x138   : > { %v970_v48 = vmul.f32 0.6931472, %v1968_v31  ;;  %v1049_v31 = vadd.f32 %v2993_v63, %v2855_v8  ;;  %v1055_v8 = vadd.f32 %v2993_v63, %v2907_v34 }
 0x13a   : > { %1691 = vst [vmem:[%s2673_s6 + $0xe8] sm:$0xff] %v970_v48  ;;  %v2975_v16 = vpop.permute.xlu1 %1112  ;;  %v3042_v62 = vmul.f32 %v1049_v31, %v1049_v31  ;;  %v3059_v35 = vmul.f32 %v1055_v8, %v1055_v8 }
 0x13b   : > { %v2977_v9 = vpop.permute.xlu0 %1164 }
 0x13e   : > { %v2979_v41 = vpop.permute.xlu1 %1120 }
 0x13f   : > { %3227 = vst [vmem:[#allocation6_spill] sm:$0xff] %v2979_v41  ;;  %v2981_v6 = vpop.permute.xlu0 %1172 }
 0x141   : > { %v1970_v23 = vpop.eup %1969 }
 0x142   : > { %v974_v33 = vmul.f32 0.6931472, %v1970_v23 }
 0x143   : > { %v1149_v1 = vpop.permute.xlu1 %1148 }
 0x144   : > { %1693 = vst [vmem:[%s2673_s6 + $0xf8] sm:$0xff] %v974_v33  ;;  %v2984_v56 = vpop.permute.xlu0 %1180  ;;  %v1212_v49 = vadd.f32 %v2998_v14, %v1149_v1  ;;  %v3031_v33 = vmul.f32 %v1048_v60, %v1048_v60  ;;  %v1315_v1 = vmul.f32 %v1047_v59, %v1047_v59  ;;  %v1129_v59 = vadd.f32 %v3007_v53, %v2939_v17 }
 0x146   : > { %v1344_v23 = vmul.f32 %v1212_v49, %v1212_v49  ;;  %v1329_v8 = vmul.f32 %v1129_v59, %v1129_v59 }
 0x147   : > { %v2986_v44 = vpop.permute.xlu1 %1152 }
 0x148   : > { %v2989_v2 = vpop.permute.xlu0 %1188  ;;  %v1360_v34 = vadd.f32 %v1344_v23, %v1328_v7 }
 0x14b   : > { %v1161_v55 = vpop.permute.xlu1 %1160 }
 0x14c   : > { %v2996_v5 = vpop.permute.xlu0 %1196  ;;  %v1215_v13 = vadd.f32 %v2998_v14, %v1161_v55  ;;  %v1057_v55 = vadd.f32 %v2993_v63, %v2923_v22  ;;  %v1135_v22 = vadd.f32 %v3007_v53, %v2941_v36 }
 0x14e   : > { %v1347_v49 = vmul.f32 %v1215_v13, %v1215_v13  ;;  %v3062_v23 = vmul.f32 %v1057_v55, %v1057_v55  ;;  %v1327_v13 = vmul.f32 %v1127_v0, %v1127_v0  ;;  %v1335_v41 = vmul.f32 %v1135_v22, %v1135_v22 }
 0x14f   : > { %v1169_v24 = vpop.permute.xlu1 %1168  ;;  %v1137_v55 = vadd.f32 %v3007_v53, %v2949_v54  ;;  %v1139_v54 = vadd.f32 %v3007_v53, %v2955_v51 }
 0x150   : > { %v3010_v4 = vpop.permute.xlu0 %1204  ;;  %v1217_v28 = vadd.f32 %v2998_v14, %v1169_v24  ;;  %v1331_v24 = vmul.f32 %v1131_v12, %v1131_v12  ;;  %v1211_v12 = vadd.f32 %v2998_v14, %v2967_v57 }
 0x152   : > { %v1349_v45 = vmul.f32 %v1217_v28, %v1217_v28  ;;  %v1363_v7 = vadd.f32 %v1347_v49, %v1331_v24  ;;  %v3072_v28 = vmul.f32 %v1130_v32, %v1130_v32  ;;  %v1141_v24 = vadd.f32 %v3007_v53, %v2962_v43 }
 0x153   : > { %v1177_v48 = vpop.permute.xlu1 %1176 }
 0x154   : > { %v1219_v17 = vadd.f32 %v2998_v14, %v1177_v48  ;;  %v1132_v48 = vadd.f32 %v3007_v53, %v2953_v39 }
 0x155   : > { %v1233_v19 = vpop.permute.xlu0 %1232 }
 0x156   : > { %v1296_v40 = vadd.f32 %v3020_v30, %v1233_v19  ;;  %v1351_v59 = vmul.f32 %v1219_v17, %v1219_v17 }
 0x157   : > { %v1185_v26 = vpop.permute.xlu1 %1184 }
 0x158   : > { %v1376_v60 = vmul.f32 %v1296_v40, %v1296_v40  ;;  %v1221_v49 = vadd.f32 %v2998_v14, %v1185_v26 }
 0x159   : > { %v1245_v15 = vpop.permute.xlu0 %1244 }
 0x15a   : > { %v1392_v31 = vadd.f32 %v1376_v60, %v1360_v34  ;;  %v1299_v52 = vadd.f32 %v3020_v30, %v1245_v15  ;;  %v3081_v15 = vadd.f32 %v3007_v53, %v2960_v42  ;;  %v1353_v51 = vmul.f32 %v1221_v49, %v1221_v49 }
 0x15b   : > { %v1193_v19 = vpop.permute.xlu1 %1192  ;;  %v1367_v42 = vadd.f32 %v1351_v59, %v1335_v41 }
 0x15c   : > { %v1408_v40 = vsub.f32 %v1312_v11, %v1392_v31  ;;  %v1379_v36 = vmul.f32 %v1299_v52, %v1299_v52  ;;  %v1365_v11 = vadd.f32 %v1349_v45, %v1333_v3  ;;  %v1343_v31 = vmul.f32 %v1211_v12, %v1211_v12 }
 0x15d   : > { %v1253_v34 = vpop.permute.xlu0 %1252  ;;  %v1337_v3 = vmul.f32 %v1137_v55, %v1137_v55  ;;  %v3086_v45 = vmul.f32 %v1132_v48, %v1132_v48 }
 0x15e   : > { %v1424_v0 = vmax.f32 %v1408_v40, 1e-08  ;;  %v1395_v60 = vadd.f32 %v1379_v36, %v1363_v7  ;;  %v1301_v58 = vadd.f32 %v3020_v30, %v1253_v34  ;;  %v1223_v7 = vadd.f32 %v2998_v14, %v1193_v19 }
 0x15f   : > { %v1201_v27 = vpop.permute.xlu1 %1200  ;;  %v1339_v36 = vmul.f32 %v1139_v54, %v1139_v54  ;;  %v1359_v12 = vadd.f32 %v1343_v31, %v1327_v13  ;;  %v1214_v34 = vadd.f32 %v2998_v14, %v2972_v29  ;;  %v1369_v48 = vadd.f32 %v1353_v51, %v1337_v3 }
 0x160   : > { %1971 = vlog2.f32 %v1424_v0  ;;  %v1411_v57 = vsub.f32 %v1315_v1, %v1395_v60  ;;  %v1381_v22 = vmul.f32 %v1301_v58, %v1301_v58  ;;  %v1213_v1 = vadd.f32 %v2998_v14, %v2986_v44 }
 0x161   : > { %v1261_v39 = vpop.permute.xlu0 %1260  ;;  %v1216_v44 = vadd.f32 %v2998_v14, %v2977_v9  ;;  %v1225_v13 = vadd.f32 %v2998_v14, %v1201_v27 }
 0x162   : > { %v1427_v52 = vmax.f32 %v1411_v57, 1e-08  ;;  %v1397_v26 = vadd.f32 %v1381_v22, %v1365_v11  ;;  %v1303_v32 = vadd.f32 %v3020_v30, %v1261_v39  ;;  %v1345_v19 = vmul.f32 %v1213_v1, %v1213_v1 }
 0x163   : > { %v1341_v57 = vmul.f32 %v1141_v24, %v1141_v24  ;;  %v1346_v22 = vmul.f32 %v1214_v34, %v1214_v34  ;;  %v1348_v39 = vmul.f32 %v1216_v44, %v1216_v44 }
 0x164   : > { %1973 = vlog2.f32 %v1427_v52  ;;  %v1413_v17 = vsub.f32 %v3042_v62, %v1397_v26  ;;  %v1383_v43 = vmul.f32 %v1303_v32, %v1303_v32  ;;  %v1229_v40 = vpop.permute.xlu1 %1228  ;;  %v1355_v62 = vmul.f32 %v1223_v7, %v1223_v7 }
 0x165   : > { %v1295_v55 = vadd.f32 %v3020_v30, %v1229_v40  ;;  %v1269_v0 = vpop.permute.xlu0 %1268  ;;  %v1361_v32 = vadd.f32 %v1345_v19, %v1329_v8  ;;  %v1357_v7 = vmul.f32 %v1225_v13, %v1225_v13  ;;  %v1362_v44 = vadd.f32 %v1346_v22, %v3072_v28 }
 0x166   : > { %v1429_v60 = vmax.f32 %v1413_v17, 1e-08  ;;  %v1399_v58 = vadd.f32 %v1383_v43, %v1367_v42  ;;  %v1305_v41 = vadd.f32 %v3020_v30, %v1269_v0  ;;  %v1371_v1 = vadd.f32 %v1355_v62, %v1339_v36 }
 0x167   : > { %v1375_v11 = vmul.f32 %v1295_v55, %v1295_v55  ;;  %v1218_v43 = vadd.f32 %v2998_v14, %v2981_v6  ;;  %v1364_v62 = vadd.f32 %v1348_v39, %v3086_v45  ;;  %v1334_v45 = vmul.f32 %v3081_v15, %v3081_v15 }
 0x168   : > { %1975 = vlog2.f32 %v1429_v60  ;;  %v1415_v49 = vsub.f32 %v3049_v10, %v1399_v58  ;;  %v1385_v29 = vmul.f32 %v1305_v41, %v1305_v41  ;;  %v1237_v59 = vpop.permute.xlu1 %1236  ;;  %v1373_v58 = vadd.f32 %v1357_v7, %v1341_v57 }
 0x169   : > { %v1391_v54 = vadd.f32 %v1375_v11, %v1359_v12  ;;  %v1297_v9 = vadd.f32 %v3020_v30, %v1237_v59  ;;  %v1277_v31 = vpop.permute.xlu0 %1276  ;;  %v1350_v28 = vmul.f32 %v1218_v43, %v1218_v43  ;;  %v1220_v57 = vadd.f32 %v2998_v14, %v2984_v56 }
 0x16a   : > { %v1431_v52 = vmax.f32 %v1415_v49, 1e-08  ;;  %v1401_v26 = vadd.f32 %v1385_v29, %v1369_v48  ;;  %v1307_v3 = vadd.f32 %v3020_v30, %v1277_v31  ;;  %v1136_v56 = vadd.f32 %v3007_v53, %v2965_v38 }
 0x16b   : > { %v1407_v51 = vsub.f32 %v3022_v25, %v1391_v54  ;;  %v1377_v27 = vmul.f32 %v1297_v9, %v1297_v9  ;;  %v1050_v54 = vadd.f32 %v2993_v63, %v2820_v20  ;;  %v1222_v20 = vadd.f32 %v2998_v14, %v2989_v2 }
 0x16c   : > { %1977 = vlog2.f32 %v1431_v52  ;;  %v1417_v10 = vsub.f32 %v3051_v21, %v1401_v26  ;;  %v1387_v24 = vmul.f32 %v1307_v3, %v1307_v3  ;;  %v1241_v42 = vpop.permute.xlu1 %1240  ;;  %v1366_v3 = vadd.f32 %v1350_v28, %v1334_v45 }
 0x16d   : > { %v1972_v17 = vpop.eup %1971  ;;  %v1423_v40 = vmax.f32 %v1407_v51, 1e-08  ;;  %v1393_v12 = vadd.f32 %v1377_v27, %v1361_v32  ;;  %v1298_v34 = vadd.f32 %v3020_v30, %v1241_v42  ;;  %v1285_v8 = vpop.permute.xlu0 %1284  ;;  %v1318_v27 = vmul.f32 %v1050_v54, %v1050_v54 }
 0x16e   : > { %v1442_v36 = vmul.f32 0.6931472, %v1972_v17  ;;  %v1433_v55 = vmax.f32 %v1417_v10, 1e-08  ;;  %v1403_v25 = vadd.f32 %v1387_v24, %v1371_v1  ;;  %v1309_v0 = vadd.f32 %v3020_v30, %v1285_v8 }
 0x16f   : > { %1979 = vlog2.f32 %v1423_v40  ;;  %v1409_v21 = vsub.f32 %v3033_v18, %v1393_v12  ;;  %v1378_v60 = vmul.f32 %v1298_v34, %v1298_v34  ;;  %v1352_v1 = vmul.f32 %v1220_v57, %v1220_v57 }
 0x170   : > { %1711 = vst [vmem:[%s2673_s6 + $0x188] sm:$0xff] %v1442_v36  ;;  %1981 = vlog2.f32 %v1433_v55  ;;  %v1419_v6 = vsub.f32 %v3059_v35, %v1403_v25  ;;  %v1389_v41 = vmul.f32 %v1309_v0, %v1309_v0  ;;  %v1249_v19 = vpop.permute.xlu1 %1248  ;;  %v1052_v7 = vadd.f32 %v2993_v63, %v2838_v50 }
 0x171   : > { %v1974_v48 = vpop.eup %1973  ;;  %v1425_v11 = vmax.f32 %v1409_v21, 1e-08  ;;  %v1394_v13 = vadd.f32 %v1378_v60, %v1362_v44  ;;  %v1300_v49 = vadd.f32 %v3020_v30, %v1249_v19  ;;  %v1138_v38 = vadd.f32 %v3007_v53, %v2970_v46 }
 0x172   : > { %v1448_v29 = vmul.f32 0.6931472, %v1974_v48  ;;  %v1435_v59 = vmax.f32 %v1419_v6, 1e-08  ;;  %v1405_v18 = vadd.f32 %v1389_v41, %v1373_v58  ;;  %v1336_v42 = vmul.f32 %v1136_v56, %v1136_v56 }
 0x173   : > { %1983 = vlog2.f32 %v1425_v11  ;;  %v1410_v35 = vsub.f32 %v3024_v37, %v1394_v13  ;;  %v1380_v22 = vmul.f32 %v1300_v49, %v1300_v49  ;;  %v1354_v40 = vmul.f32 %v1222_v20, %v1222_v20 }
 0x174   : > { %1714 = vst [vmem:[%s2673_s6 + $0x1a0] sm:$0xff] %v1448_v29  ;;  %1985 = vlog2.f32 %v1435_v59  ;;  %v1421_v9 = vsub.f32 %v3062_v23, %v1405_v18  ;;  %v1257_v31 = vpop.permute.xlu1 %1256  ;;  %v1368_v34 = vadd.f32 %v1352_v1, %v1336_v42  ;;  %v1320_v36 = vmul.f32 %v1052_v7, %v1052_v7  ;;  %v3228_v29 = vld [vmem:[#allocation6_spill] sm:$0xff] }
 0x175   : > { %v1976_v39 = vpop.eup %1975  ;;  %v1426_v52 = vmax.f32 %v1410_v35, 1e-08  ;;  %v1396_v26 = vadd.f32 %v1380_v22, %v1364_v62  ;;  %v1302_v37 = vadd.f32 %v3020_v30, %v1257_v31  ;;  %v1054_v55 = vadd.f32 %v2993_v63, %v2857_v61 }
 0x176   : > { %v1452_v32 = vmul.f32 0.6931472, %v1976_v39  ;;  %v1437_v15 = vmax.f32 %v1421_v9, 1e-08  ;;  %v1338_v25 = vmul.f32 %v1138_v38, %v1138_v38  ;;  %v1140_v0 = vadd.f32 %v3007_v53, %v2975_v16 }
 0x177   : > { %1987 = vlog2.f32 %v1426_v52  ;;  %v1412_v23 = vsub.f32 %v3031_v33, %v1396_v26  ;;  %v1382_v51 = vmul.f32 %v1302_v37, %v1302_v37  ;;  %v1224_v33 = vadd.f32 %v2998_v14, %v2996_v5 }
 0x178   : > { %1716 = vst [vmem:[%s2673_s6 + $0x1b0] sm:$0xff] %v1452_v32  ;;  %1989 = vlog2.f32 %v1437_v15  ;;  %v1265_v10 = vpop.permute.xlu1 %1264  ;;  %v1370_v41 = vadd.f32 %v1354_v40, %v1338_v25  ;;  %v1226_v62 = vadd.f32 %v2998_v14, %v3010_v4  ;;  %v1322_v13 = vmul.f32 %v1054_v55, %v1054_v55 }
 0x179   : > { %v1978_v24 = vpop.eup %1977  ;;  %v1428_v2 = vmax.f32 %v1412_v23, 1e-08  ;;  %v1398_v17 = vadd.f32 %v1382_v51, %v1366_v3  ;;  %v1304_v43 = vadd.f32 %v3020_v30, %v1265_v10  ;;  %v1356_v19 = vmul.f32 %v1224_v33, %v1224_v33 }
 0x17a   : > { %v1456_v12 = vmul.f32 0.6931472, %v1978_v24  ;;  %v1056_v49 = vadd.f32 %v2993_v63, %v2877_v47  ;;  %v1340_v28 = vmul.f32 %v1140_v0, %v1140_v0  ;;  %v1142_v59 = vadd.f32 %v3007_v53, %v3228_v29  ;;  %v3229_v53 = vld [vmem:[#allocation5_spill] sm:$0xff] }
 0x17b   : > { %1991 = vlog2.f32 %v1428_v2  ;;  %v1414_v50 = vsub.f32 %v1318_v27, %v1398_v17  ;;  %v1384_v8 = vmul.f32 %v1304_v43, %v1304_v43  ;;  %v1358_v9 = vmul.f32 %v1226_v62, %v1226_v62 }
 0x17c   : > { %v1980_v46 = vpop.eup %1979  ;;  %1718 = vst [vmem:[%s2673_s6 + $0x1c0] sm:$0xff] %v1456_v12  ;;  %v1273_v44 = vpop.permute.xlu1 %1272  ;;  %v1372_v54 = vadd.f32 %v1356_v19, %v1340_v28  ;;  %v1324_v56 = vmul.f32 %v1056_v49, %v1056_v49  ;;  %v1058_v52 = vadd.f32 %v2993_v63, %v3229_v53  ;;  %v1342_v26 = vmul.f32 %v1142_v59, %v1142_v59 }
 0x17d   : > { %v1982_v21 = vpop.eup %1981  ;;  %v1440_v60 = vmul.f32 0.6931472, %v1980_v46  ;;  %v1430_v5 = vmax.f32 %v1414_v50, 1e-08  ;;  %v1400_v58 = vadd.f32 %v1384_v8, %v1368_v34  ;;  %v1306_v6 = vadd.f32 %v3020_v30, %v1273_v44 }
 0x17e   : > { %v1460_v48 = vmul.f32 0.6931472, %v1982_v21  ;;  %v1374_v51 = vadd.f32 %v1358_v9, %v1342_v26  ;;  %v1326_v63 = vmul.f32 %v1058_v52, %v1058_v52 }
 0x17f   : > { %1710 = vst [vmem:[%s2673_s6 + $0x180] sm:$0xff] %v1440_v60  ;;  %1993 = vlog2.f32 %v1430_v5  ;;  %v1416_v61 = vsub.f32 %v1320_v36, %v1400_v58  ;;  %v1386_v11 = vmul.f32 %v1306_v6, %v1306_v6 }
 0x180   : > { %v1984_v16 = vpop.eup %1983  ;;  %1720 = vst [vmem:[%s2673_s6 + $0x1d0] sm:$0xff] %v1460_v48  ;;  %v1281_v18 = vpop.permute.xlu1 %1280 }
 0x181   : > { %v1986_v57 = vpop.eup %1985  ;;  %v1444_v35 = vmul.f32 0.6931472, %v1984_v16  ;;  %v1432_v14 = vmax.f32 %v1416_v61, 1e-08  ;;  %v1402_v4 = vadd.f32 %v1386_v11, %v1370_v41  ;;  %v1308_v22 = vadd.f32 %v3020_v30, %v1281_v18 }
 0x182   : > { %v1464_v45 = vmul.f32 0.6931472, %v1986_v57 }
 0x183   : > { %1712 = vst [vmem:[%s2673_s6 + $0x190] sm:$0xff] %v1444_v35  ;;  %1995 = vlog2.f32 %v1432_v14  ;;  %v1418_v47 = vsub.f32 %v1322_v13, %v1402_v4  ;;  %v1388_v31 = vmul.f32 %v1308_v22, %v1308_v22 }
 0x184   : > { %v1988_v39 = vpop.eup %1987  ;;  %1722 = vst [vmem:[%s2673_s6 + $0x1e0] sm:$0xff] %v1464_v45  ;;  %v1289_v37 = vpop.permute.xlu1 %1288 }
 0x185   : > { %v1990_v3 = vpop.eup %1989  ;;  %v1446_v20 = vmul.f32 0.6931472, %v1988_v39  ;;  %v1434_v32 = vmax.f32 %v1418_v47, 1e-08  ;;  %v1404_v15 = vadd.f32 %v1388_v31, %v1372_v54  ;;  %v1310_v1 = vadd.f32 %v3020_v30, %v1289_v37 }
 0x186   : > { %v1468_v23 = vmul.f32 0.6931472, %v1990_v3 }
 0x187   : > { %1713 = vst [vmem:[%s2673_s6 + $0x198] sm:$0xff] %v1446_v20  ;;  %1997 = vlog2.f32 %v1434_v32  ;;  %v1420_v27 = vsub.f32 %v1324_v56, %v1404_v15  ;;  %v1390_v7 = vmul.f32 %v1310_v1, %v1310_v1 }
 0x188   : > { %v1992_v38 = vpop.eup %1991  ;;  %1724 = vst [vmem:[%s2673_s6 + $0x1f0] sm:$0xff] %v1468_v23 }
 0x189   : > { %v1450_v10 = vmul.f32 0.6931472, %v1992_v38  ;;  %v1436_v24 = vmax.f32 %v1420_v27, 1e-08  ;;  %v1406_v42 = vadd.f32 %v1390_v7, %v1374_v51 }
 0x18b   : > { %1715 = vst [vmem:[%s2673_s6 + $0x1a8] sm:$0xff] %v1450_v10  ;;  %1999 = vlog2.f32 %v1436_v24  ;;  %v1422_v30 = vsub.f32 %v1326_v63, %v1406_v42 }
 0x18c   : > { %v1994_v2 = vpop.eup %1993 }
 0x18d   : > { %v1454_v17 = vmul.f32 0.6931472, %v1994_v2  ;;  %v1438_v43 = vmax.f32 %v1422_v30, 1e-08 }
 0x18f   : > { %1717 = vst [vmem:[%s2673_s6 + $0x1b8] sm:$0xff] %v1454_v17  ;;  %2001 = vlog2.f32 %v1438_v43 }
 0x190   : > { %v1996_v40 = vpop.eup %1995 }
 0x191   : > { %v1458_v33 = vmul.f32 0.6931472, %v1996_v40 }
 0x193   : > { %1719 = vst [vmem:[%s2673_s6 + $0x1c8] sm:$0xff] %v1458_v33 }
 0x194   : > { %v1998_v12 = vpop.eup %1997 }
 0x195   : > { %v1462_v34 = vmul.f32 0.6931472, %v1998_v12 }
 0x197   : > { %1721 = vst [vmem:[%s2673_s6 + $0x1d8] sm:$0xff] %v1462_v34 }
 0x198   : > { %v2000_v50 = vpop.eup %1999 }
 0x199   : > { %v1466_v8 = vmul.f32 0.6931472, %v2000_v50 }
 0x19b   : > { %1723 = vst [vmem:[%s2673_s6 + $0x1e8] sm:$0xff] %v1466_v8 }
 0x19c   : > { %v2002_v46 = vpop.eup %2001 }
 0x19d   : > { %v1470_v36 = vmul.f32 0.6931472, %v2002_v46 }
 0x19f   : > { %1725 = vst [vmem:[%s2673_s6 + $0x1f8] sm:$0xff] %v1470_v36 }
 0x1a0   : > { %2028 = shalt.err (!%p2025_p5)
}
 0x1a1   : > { %s2029_s26 = scalar_lea.hbm %s3169_s18, 8192  ;;  %s2033_s29 = scalar_lea.hbm %s3223_s2, 16384 }
 0x1a2   : > { %p2030_p6 = scmp.ne.s32.totalorder %s3169_s18, %s2029_s26  ;;  %p2034_p10 = scmp.lt.s32.totalorder %s3169_s18, %s3223_s2 }
 0x1a3   : > { %p2035_p11 = scmp.lt.s32.totalorder %s2033_s29, %s2029_s26 }
 0x1a4   : > { %p2031_p7 = pnand %p2030_p6, %p2158_p4 }
 0x1a5   : > { %p2036_p12 = por %p2035_p11, %p2034_p10 }
 0x1a6   : > { %p2032_p9 = pneg %p2031_p7 }
 0x1a8   : > { %p2037_p13 = pnand %p2036_p12, %p2032_p9 }
 0x1aa   : > { %2040 = shalt.err (!%p2037_p13)
}
 0x1ab   : > { %s2101_s4 = smov 128   ;;  %s2102_s5 = smov 8  }
 0x1ac   : > { %1733 = dma.vmem_to_hbm [thread:$0]  (%p2158_p4), %s3171_s8, 8192, %s3169_s18, %s3176_s20, %s2101_s4, %s2101_s4, %s2102_s5  }
 0x1ad PF: > { %p1739_p0 = scmp.ge.s32.totalorder %s2091_s14, 2  ;;  %s1570_s6 = sand.u32 1, %s2071_s9  }
 0x1ae   : > { %s1571_s7 = scalar_lea.sflag [#allocation3], %s1570_s6 }
 0x1af   : > { %p1736_p1 = pnand %p1739_p0, %p2165_p8 }
 0x1b1   : > { %p1737_p2 = pneg %p1736_p1 }
 0x1b3   : > { %2066 = dma.done.wait (%p1737_p2), %s1571_s7, 8192  }
 0x1b4   : > { %2068 = vsyncadd (%p1737_p2), %s1571_s7, 4294959104  ;;  %s15_s14 = sadd.s32 1, %s2091_s14   ;;  %s3230_s9 = smov %s2075_s10 }
 0x1b5   : > { %p12_p3 = scmp.ge.s32.totalorder %s15_s14, 4   ;;  %s3231_s10 = smov %s2079_s11 }
 0x1b6   : > { %s3232_s11 = smov %s2171_s22  ;;  %s3233_s12 = smov %s2087_s13 }
 0x1b7   : > { %s3234_s13 = smov %s3236_s17  ;;  %14 = sbr.rel (!%p12_p3) target bundleno = 4 (0x4), region = 69 }
 0x1bc   :  { %1576 = vsyncpa [#allocation3], 1 }
 0x1bd   :  { %1578 = vsyncpa [#allocation3 + $0x1], 1 }

</bundles_post_ra>
